<compile_context>
chip_gen: v5e
topology: v5e:2x2
jax: 0.10.0
libtpu: 0.0.40
codegen_flags: <defaults>
</compile_context>

<pallas_src>
import functools
import math

import jax
import jax.numpy as jnp
from jax.experimental import pallas as pl
from jax.experimental.pallas import tpu as pltpu

HIDDEN = 128          # fixed by the PyTorch module
_HALF_LOG_2PI = 0.5 * math.log(2.0 * math.pi)


def _round_up(x, m):
    return ((x + m - 1) // m) * m


def _choose_tb(batch):
    """Batch tile: ~B/2 (>=2 grid steps for v7x megacore), sublane-aligned,
    capped at 1024 (VMEM per step stays a few MiB, far under limits)."""
    tb = _round_up(max(1, -(-batch // 2)), 8)
    return max(8, min(tb, 1024))


def _actor_kernel(x_ref, noise_ref,
                  w1_ref, b1_ref, w2_ref, b2_ref, w3_ref, b3_ref,
                  w4_ref, b4_ref, std_ref, lp_bias_ref,
                  action_ref, logp_ref):
    x = x_ref[...]                                            # [TB, in_dim]

    # --- MLP: 3x (Linear + ReLU) + final Linear, all on the MXU ---
    # TODO(synk): optionally cast to bf16 on v5e for bandwidth; kept f32 here
    # to preserve the tight 1e-4 parity with the reference.
    h = jnp.dot(x, w1_ref[...], preferred_element_type=jnp.float32) + b1_ref[...]
    h = jnp.maximum(h, 0.0)
    h = jnp.dot(h, w2_ref[...], preferred_element_type=jnp.float32) + b2_ref[...]
    h = jnp.maximum(h, 0.0)
    h = jnp.dot(h, w3_ref[...], preferred_element_type=jnp.float32) + b3_ref[...]
    h = jnp.maximum(h, 0.0)
    means = jnp.dot(h, w4_ref[...], preferred_element_type=jnp.float32) + b4_ref[...]

    # --- Normal(means, std): sample + summed log_prob ---
    noise = noise_ref[...]                                    # [TB, out_dim]
    action_ref[...] = means + std_ref[...] * noise            # [TB, out_dim]

    # (action - means)/std == noise algebraically; lp_bias = -(log_std + c).
    lp = -0.5 * noise * noise + lp_bias_ref[...]
    logp_ref[...] = jnp.sum(lp, axis=-1, keepdims=True)       # [TB, 1]


@jax.jit
def actor_continuous_forward(state, params, noise):
    """state: [B, input_dim] f32; noise: [B, output_dim] f32 standard normal."""
    B, input_dim = state.shape
    out_dim = params["w4"].shape[1]

    tb = _choose_tb(B)
    b_pad = _round_up(B, tb)
    if b_pad != B:  # pad only the batch (sublane) axis; fuses under jit
        state = jnp.pad(state, ((0, b_pad - B), (0, 0)))
        noise = jnp.pad(noise, ((0, b_pad - B), (0, 0)))
    state = state.astype(jnp.float32)
    noise = noise.astype(jnp.float32)

    # Precompute the distribution constants once (outside the grid loop).
    log_std = params["log_std"].astype(jnp.float32)           # [1, out_dim]
    std = jnp.exp(log_std)                                    # [1, out_dim]
    lp_bias = -(log_std + _HALF_LOG_2PI)                      # [1, out_dim]

    def row_spec(feat):
        return pl.BlockSpec((tb, feat), lambda i: (i, 0))

    def const_spec(arr):
        # Whole-array block, same block every grid step -> stays VMEM-resident.
        return pl.BlockSpec(arr.shape, lambda i: (0,) * arr.ndim)

    weights = (params["w1"], params["b1"], params["w2"], params["b2"],
               params["w3"], params["b3"], params["w4"], params["b4"],
               std, lp_bias)
    in_specs = ([row_spec(input_dim), row_spec(out_dim)]
                + [const_spec(a) for a in weights])

    action, logp = pl.pallas_call(
        _actor_kernel,
        out_shape=(jax.ShapeDtypeStruct((b_pad, out_dim), jnp.float32),
                   jax.ShapeDtypeStruct((b_pad, 1), jnp.float32)),
        grid=(b_pad // tb,),
        in_specs=in_specs,
        out_specs=(row_spec(out_dim), row_spec(1)),
        compiler_params=pltpu.CompilerParams(
            dimension_semantics=("parallel",)),   # v7x: shard batch over 2 TCs
    )(state, noise, *weights)

    return action[:B], logp[:B]


def init_params(key, input_dim, output_dim):
    """Deterministic synthetic init (PyTorch-like uniform fan-in scaling)."""
    def linear(k, fan_in, fan_out):
        kw, kb = jax.random.split(k)
        bound = 1.0 / math.sqrt(fan_in)
        w = jax.random.uniform(kw, (fan_in, fan_out), jnp.float32, -bound, bound)
        b = jax.random.uniform(kb, (1, fan_out), jnp.float32, -bound, bound)
        return w, b

    k1, k2, k3, k4 = jax.random.split(key, 4)
    w1, b1 = linear(k1, input_dim, HIDDEN)
    w2, b2 = linear(k2, HIDDEN, HIDDEN)
    w3, b3 = linear(k3, HIDDEN, HIDDEN)
    w4, b4 = linear(k4, HIDDEN, output_dim)
    return {
        "w1": w1, "b1": b1, "w2": w2, "b2": b2,
        "w3": w3, "b3": b3, "w4": w4, "b4": b4,
        "log_std": jnp.zeros((1, output_dim), jnp.float32),
    }


def _reference_forward(state, params, noise):
    """Pure-JAX reference of the original forward pass (redundant z form kept)."""
    h = jnp.maximum(state @ params["w1"] + params["b1"], 0.0)
    h = jnp.maximum(h @ params["w2"] + params["b2"], 0.0)
    h = jnp.maximum(h @ params["w3"] + params["b3"], 0.0)
    means = h @ params["w4"] + params["b4"]
    std = jnp.exp(params["log_std"])
    action = means + std * noise
    z = (action - means) / std
    lp = -0.5 * z * z - params["log_std"] - _HALF_LOG_2PI
    return action, jnp.sum(lp, axis=-1, keepdims=True)


if __name__ == "__main__":
    INPUT_DIM = 32
    OUTPUT_DIM = 8
    BATCH = 512   # -> TB=256, grid=(2,): exercises the batched/parallel path

    key = jax.random.PRNGKey(0)
    k_params, k_state, k_noise = jax.random.split(key, 3)

    params = init_params(k_params, INPUT_DIM, OUTPUT_DIM)
    state = jax.random.normal(k_state, (BATCH, INPUT_DIM), jnp.float32)
    noise = jax.random.normal(k_noise, (BATCH, OUTPUT_DIM), jnp.float32)

    action, logp = actor_continuous_forward(state, params, noise)
    jax.block_until_ready((action, logp))

    ref_action, ref_logp = _reference_forward(state, params, noise)
    assert action.shape == (BATCH, OUTPUT_DIM)
    assert logp.shape == (BATCH, 1)
    assert jnp.allclose(action, ref_action, atol=1e-4, rtol=1e-4)
    assert jnp.allclose(logp, ref_logp, atol=1e-4, rtol=1e-4)

    print("KERNEL_OK")
</pallas_src>

<mosaic_0001>
module attributes {stable_mosaic.version = 11 : i64} {
  func.func @_actor_kernel(%arg0: i32, %arg1: memref<256x32xf32, #tpu.memory_space<vmem>>, %arg2: memref<256x8xf32, #tpu.memory_space<vmem>>, %arg3: memref<32x128xf32, #tpu.memory_space<vmem>>, %arg4: memref<1x128xf32, #tpu.memory_space<vmem>>, %arg5: memref<128x128xf32, #tpu.memory_space<vmem>>, %arg6: memref<1x128xf32, #tpu.memory_space<vmem>>, %arg7: memref<128x128xf32, #tpu.memory_space<vmem>>, %arg8: memref<1x128xf32, #tpu.memory_space<vmem>>, %arg9: memref<128x8xf32, #tpu.memory_space<vmem>>, %arg10: memref<1x8xf32, #tpu.memory_space<vmem>>, %arg11: memref<1x8xf32, #tpu.memory_space<vmem>>, %arg12: memref<1x8xf32, #tpu.memory_space<vmem>>, %arg13: memref<256x8xf32, #tpu.memory_space<vmem>>, %arg14: memref<256x1xf32, #tpu.memory_space<vmem>>) attributes {dimension_semantics = [#tpu.dimension_semantics<parallel>], iteration_bounds = array<i64: 2>, scalar_prefetch = 0 : i64, scratch_operands = 0 : i64, tpu.core_type = #tpu.core_type<tc>, window_params = [{transform_indices = @transform_0, window_bounds = array<i64: 256, 32>}, {transform_indices = @transform_1, window_bounds = array<i64: 256, 8>}, {pipeline_mode = #tpu.pipeline_mode<synchronous>, transform_indices = @transform_2, window_bounds = array<i64: 32, 128>}, {pipeline_mode = #tpu.pipeline_mode<synchronous>, transform_indices = @transform_3, window_bounds = array<i64: 1, 128>}, {pipeline_mode = #tpu.pipeline_mode<synchronous>, transform_indices = @transform_4, window_bounds = array<i64: 128, 128>}, {pipeline_mode = #tpu.pipeline_mode<synchronous>, transform_indices = @transform_5, window_bounds = array<i64: 1, 128>}, {pipeline_mode = #tpu.pipeline_mode<synchronous>, transform_indices = @transform_6, window_bounds = array<i64: 128, 128>}, {pipeline_mode = #tpu.pipeline_mode<synchronous>, transform_indices = @transform_7, window_bounds = array<i64: 1, 128>}, {pipeline_mode = #tpu.pipeline_mode<synchronous>, transform_indices = @transform_8, window_bounds = array<i64: 128, 8>}, {pipeline_mode = #tpu.pipeline_mode<synchronous>, transform_indices = @transform_9, window_bounds = array<i64: 1, 8>}, {pipeline_mode = #tpu.pipeline_mode<synchronous>, transform_indices = @transform_10, window_bounds = array<i64: 1, 8>}, {pipeline_mode = #tpu.pipeline_mode<synchronous>, transform_indices = @transform_11, window_bounds = array<i64: 1, 8>}, {transform_indices = @transform_12, window_bounds = array<i64: 256, 8>}, {transform_indices = @transform_13, window_bounds = array<i64: 256, 1>}]} {
    %c0 = arith.constant 0 : index
    %c0_0 = arith.constant 0 : index
    %0 = vector.load %arg1[%c0, %c0_0] : memref<256x32xf32, #tpu.memory_space<vmem>>, vector<256x32xf32>
    %c0_1 = arith.constant 0 : index
    %c0_2 = arith.constant 0 : index
    %1 = vector.load %arg3[%c0_1, %c0_2] : memref<32x128xf32, #tpu.memory_space<vmem>>, vector<32x128xf32>
    %cst = arith.constant dense<0.000000e+00> : vector<256x128xf32>
    %2 = tpu.matmul %0, %1, %cst {dimension_numbers = #tpu.dot_dimension_numbers<[1], [0], [0], [1], [0, 0, 1, 1], [], []>} : vector<256x32xf32>, vector<32x128xf32>, vector<256x128xf32> -> vector<256x128xf32>
    %c0_3 = arith.constant 0 : index
    %c0_4 = arith.constant 0 : index
    %3 = vector.load %arg4[%c0_3, %c0_4] : memref<1x128xf32, #tpu.memory_space<vmem>>, vector<1x128xf32>
    %4 = vector.broadcast %3 : vector<1x128xf32> to vector<256x128xf32>
    %5 = arith.addf %2, %4 : vector<256x128xf32>
    %cst_5 = arith.constant 0.000000e+00 : f32
    %6 = vector.broadcast %cst_5 : f32 to vector<256x128xf32>
    %7 = arith.maximumf %5, %6 : vector<256x128xf32>
    %c0_6 = arith.constant 0 : index
    %c0_7 = arith.constant 0 : index
    %8 = vector.load %arg5[%c0_6, %c0_7] : memref<128x128xf32, #tpu.memory_space<vmem>>, vector<128x128xf32>
    %cst_8 = arith.constant dense<0.000000e+00> : vector<256x128xf32>
    %9 = tpu.matmul %7, %8, %cst_8 {dimension_numbers = #tpu.dot_dimension_numbers<[1], [0], [0], [1], [0, 0, 1, 1], [], []>} : vector<256x128xf32>, vector<128x128xf32>, vector<256x128xf32> -> vector<256x128xf32>
    %c0_9 = arith.constant 0 : index
    %c0_10 = arith.constant 0 : index
    %10 = vector.load %arg6[%c0_9, %c0_10] : memref<1x128xf32, #tpu.memory_space<vmem>>, vector<1x128xf32>
    %11 = vector.broadcast %10 : vector<1x128xf32> to vector<256x128xf32>
    %12 = arith.addf %9, %11 : vector<256x128xf32>
    %cst_11 = arith.constant 0.000000e+00 : f32
    %13 = vector.broadcast %cst_11 : f32 to vector<256x128xf32>
    %14 = arith.maximumf %12, %13 : vector<256x128xf32>
    %c0_12 = arith.constant 0 : index
    %c0_13 = arith.constant 0 : index
    %15 = vector.load %arg7[%c0_12, %c0_13] : memref<128x128xf32, #tpu.memory_space<vmem>>, vector<128x128xf32>
    %cst_14 = arith.constant dense<0.000000e+00> : vector<256x128xf32>
    %16 = tpu.matmul %14, %15, %cst_14 {dimension_numbers = #tpu.dot_dimension_numbers<[1], [0], [0], [1], [0, 0, 1, 1], [], []>} : vector<256x128xf32>, vector<128x128xf32>, vector<256x128xf32> -> vector<256x128xf32>
    %c0_15 = arith.constant 0 : index
    %c0_16 = arith.constant 0 : index
    %17 = vector.load %arg8[%c0_15, %c0_16] : memref<1x128xf32, #tpu.memory_space<vmem>>, vector<1x128xf32>
    %18 = vector.broadcast %17 : vector<1x128xf32> to vector<256x128xf32>
    %19 = arith.addf %16, %18 : vector<256x128xf32>
    %cst_17 = arith.constant 0.000000e+00 : f32
    %20 = vector.broadcast %cst_17 : f32 to vector<256x128xf32>
    %21 = arith.maximumf %19, %20 : vector<256x128xf32>
    %c0_18 = arith.constant 0 : index
    %c0_19 = arith.constant 0 : index
    %22 = vector.load %arg9[%c0_18, %c0_19] : memref<128x8xf32, #tpu.memory_space<vmem>>, vector<128x8xf32>
    %cst_20 = arith.constant dense<0.000000e+00> : vector<256x8xf32>
    %23 = tpu.matmul %21, %22, %cst_20 {dimension_numbers = #tpu.dot_dimension_numbers<[1], [0], [0], [1], [0, 0, 1, 1], [], []>} : vector<256x128xf32>, vector<128x8xf32>, vector<256x8xf32> -> vector<256x8xf32>
    %c0_21 = arith.constant 0 : index
    %c0_22 = arith.constant 0 : index
    %24 = vector.load %arg10[%c0_21, %c0_22] : memref<1x8xf32, #tpu.memory_space<vmem>>, vector<1x8xf32>
    %25 = vector.broadcast %24 : vector<1x8xf32> to vector<256x8xf32>
    %26 = arith.addf %23, %25 : vector<256x8xf32>
    %c0_23 = arith.constant 0 : index
    %c0_24 = arith.constant 0 : index
    %27 = vector.load %arg2[%c0_23, %c0_24] : memref<256x8xf32, #tpu.memory_space<vmem>>, vector<256x8xf32>
    %c0_25 = arith.constant 0 : index
    %c0_26 = arith.constant 0 : index
    %28 = vector.load %arg11[%c0_25, %c0_26] : memref<1x8xf32, #tpu.memory_space<vmem>>, vector<1x8xf32>
    %29 = vector.broadcast %28 : vector<1x8xf32> to vector<256x8xf32>
    %30 = arith.mulf %29, %27 : vector<256x8xf32>
    %31 = arith.addf %26, %30 : vector<256x8xf32>
    %c0_27 = arith.constant 0 : index
    %c0_28 = arith.constant 0 : index
    %32 = vector.load %arg13[%c0_27, %c0_28] : memref<256x8xf32, #tpu.memory_space<vmem>>, vector<256x8xf32>
    tpu.vector_store %arg13[%c0_27, %c0_28], %31 {strides = array<i32>} : memref<256x8xf32, #tpu.memory_space<vmem>>, vector<256x8xf32>,
    %cst_29 = arith.constant -5.000000e-01 : f32
    %33 = vector.broadcast %cst_29 : f32 to vector<256x8xf32>
    %34 = arith.mulf %33, %27 : vector<256x8xf32>
    %35 = arith.mulf %34, %27 : vector<256x8xf32>
    %c0_30 = arith.constant 0 : index
    %c0_31 = arith.constant 0 : index
    %36 = vector.load %arg12[%c0_30, %c0_31] : memref<1x8xf32, #tpu.memory_space<vmem>>, vector<1x8xf32>
    %37 = vector.broadcast %36 : vector<1x8xf32> to vector<256x8xf32>
    %38 = arith.addf %35, %37 : vector<256x8xf32>
    %cst_32 = arith.constant dense<0.000000e+00> : vector<256xf32>
    %39 = vector.multi_reduction <add>, %38, %cst_32 [1] : vector<256x8xf32> to vector<256xf32>
    %40 = vector.shape_cast %39 : vector<256xf32> to vector<256x1xf32>
    %c0_33 = arith.constant 0 : index
    %c0_34 = arith.constant 0 : index
    %41 = vector.load %arg14[%c0_33, %c0_34] : memref<256x1xf32, #tpu.memory_space<vmem>>, vector<256x1xf32>
    tpu.vector_store %arg14[%c0_33, %c0_34], %40 {strides = array<i32>} : memref<256x1xf32, #tpu.memory_space<vmem>>, vector<256x1xf32>,
    return
  }
  func.func @transform_0(%arg0: i32) -> (i32, i32) {
    %c0_i32 = arith.constant 0 : i32
    %c0_i32_0 = arith.constant 0 : i32
    return %arg0, %c0_i32 : i32, i32
  }
  func.func @transform_1(%arg0: i32) -> (i32, i32) {
    %c0_i32 = arith.constant 0 : i32
    %c0_i32_0 = arith.constant 0 : i32
    return %arg0, %c0_i32 : i32, i32
  }
  func.func @transform_2(%arg0: i32) -> (i32, i32) {
    %c0_i32 = arith.constant 0 : i32
    %c0_i32_0 = arith.constant 0 : i32
    %c0_i32_1 = arith.constant 0 : i32
    return %c0_i32, %c0_i32_0 : i32, i32
  }
  func.func @transform_3(%arg0: i32) -> (i32, i32) {
    %c0_i32 = arith.constant 0 : i32
    %c0_i32_0 = arith.constant 0 : i32
    %c0_i32_1 = arith.constant 0 : i32
    return %c0_i32, %c0_i32_0 : i32, i32
  }
  func.func @transform_4(%arg0: i32) -> (i32, i32) {
    %c0_i32 = arith.constant 0 : i32
    %c0_i32_0 = arith.constant 0 : i32
    %c0_i32_1 = arith.constant 0 : i32
    return %c0_i32, %c0_i32_0 : i32, i32
  }
  func.func @transform_5(%arg0: i32) -> (i32, i32) {
    %c0_i32 = arith.constant 0 : i32
    %c0_i32_0 = arith.constant 0 : i32
    %c0_i32_1 = arith.constant 0 : i32
    return %c0_i32, %c0_i32_0 : i32, i32
  }
  func.func @transform_6(%arg0: i32) -> (i32, i32) {
    %c0_i32 = arith.constant 0 : i32
    %c0_i32_0 = arith.constant 0 : i32
    %c0_i32_1 = arith.constant 0 : i32
    return %c0_i32, %c0_i32_0 : i32, i32
  }
  func.func @transform_7(%arg0: i32) -> (i32, i32) {
    %c0_i32 = arith.constant 0 : i32
    %c0_i32_0 = arith.constant 0 : i32
    %c0_i32_1 = arith.constant 0 : i32
    return %c0_i32, %c0_i32_0 : i32, i32
  }
  func.func @transform_8(%arg0: i32) -> (i32, i32) {
    %c0_i32 = arith.constant 0 : i32
    %c0_i32_0 = arith.constant 0 : i32
    %c0_i32_1 = arith.constant 0 : i32
    return %c0_i32, %c0_i32_0 : i32, i32
  }
  func.func @transform_9(%arg0: i32) -> (i32, i32) {
    %c0_i32 = arith.constant 0 : i32
    %c0_i32_0 = arith.constant 0 : i32
    %c0_i32_1 = arith.constant 0 : i32
    return %c0_i32, %c0_i32_0 : i32, i32
  }
  func.func @transform_10(%arg0: i32) -> (i32, i32) {
    %c0_i32 = arith.constant 0 : i32
    %c0_i32_0 = arith.constant 0 : i32
    %c0_i32_1 = arith.constant 0 : i32
    return %c0_i32, %c0_i32_0 : i32, i32
  }
  func.func @transform_11(%arg0: i32) -> (i32, i32) {
    %c0_i32 = arith.constant 0 : i32
    %c0_i32_0 = arith.constant 0 : i32
    %c0_i32_1 = arith.constant 0 : i32
    return %c0_i32, %c0_i32_0 : i32, i32
  }
  func.func @transform_12(%arg0: i32) -> (i32, i32) {
    %c0_i32 = arith.constant 0 : i32
    %c0_i32_0 = arith.constant 0 : i32
    return %arg0, %c0_i32 : i32, i32
  }
  func.func @transform_13(%arg0: i32) -> (i32, i32) {
    %c0_i32 = arith.constant 0 : i32
    %c0_i32_0 = arith.constant 0 : i32
    return %arg0, %c0_i32 : i32, i32
  }
}

</mosaic_0001>

<bundles_post_ra>
// kernel: actor_continuous_forward.1
= control target key start
LH: loop header
LB: loop body
LE: loop exit
PB: predicated region body
PF: predicated region fallthrough
CT: control target
= control target key end

     0   :  { %s1828_s25 = smov 0   ;;  %s2624_s0 = inlined_call_operand.vmem [shape: f32[512,32], index: 0, kind: input, shape index: {}]   ;;  %s2625_s1 = inlined_call_operand.vmem [shape: f32[512,8], index: 1, kind: input, shape index: {}]   ;;  %s2626_s2 = inlined_call_operand.vmem [shape: f32[32,128], index: 2, kind: input, shape index: {}]   ;;  %s2627_s3 = inlined_call_operand.vmem [shape: f32[1,128], index: 3, kind: input, shape index: {}]   ;;  %s2628_s4 = inlined_call_operand.vmem [shape: f32[128,128], index: 4, kind: input, shape index: {}]   ;;  %s2629_s5 = inlined_call_operand.vmem [shape: f32[1,128], index: 5, kind: input, shape index: {}]   ;;  %s2630_s6 = inlined_call_operand.vmem [shape: f32[128,128], index: 6, kind: input, shape index: {}]   ;;  %s2631_s7 = inlined_call_operand.vmem [shape: f32[1,128], index: 7, kind: input, shape index: {}]   ;;  %s2632_s8 = inlined_call_operand.vmem [shape: f32[128,8], index: 8, kind: input, shape index: {}]   ;;  %s2633_s9 = inlined_call_operand.vmem [shape: f32[1,8], index: 9, kind: input, shape index: {}]   ;;  %s2634_s10 = inlined_call_operand.vmem [shape: f32[1,8], index: 10, kind: input, shape index: {}]   ;;  %s2635_s11 = inlined_call_operand.vmem [shape: f32[1,8], index: 11, kind: input, shape index: {}]   ;;  %s2636_s12 = inlined_call_operand.vmem [shape: f32[512,8], index: 12, kind: output, shape index: {0}]   ;;  %s2637_s13 = inlined_call_operand.vmem [shape: f32[512,1], index: 13, kind: output, shape index: {1}]  }
   0x1 LB: > { %s1689_s26 = sadd.s32 4294967295, %s1756_s25   ;;  %p1693_p0 = scmp.ge.s32.totalorder %s1756_s25, 1  ;;  %s1756_s25 = sphi %s1828_s25, %s24_s25  }
   0x2   : > { %p402_p1 = scmp.lt.s32.totalorder %s1756_s25, 3 }
   0x4   : > { %p403_p2 = pnand %p1693_p0, %p402_p1 }
   0x5   : > { %s1694_s14 = sshll.u32 (!%p403_p2), %s1689_s26, 5 }
   0x6   : > { %406 = sbr.rel (%p403_p2) target bundleno = 800 (0x320), region = 68  ;;  %p457_p3 = scmp.lt.s32.totalorder (!%p403_p2), %s1694_s14, 63 }
   0xb   : > { %v515_v0 = vld [vmem:[%s2626_s2 + $0x18] sm:$0xff]  ;;  %v514_v1 = vld [vmem:[%s2626_s2 + $0x10] sm:$0xff]  ;;  %v513_v2 = vld [vmem:[%s2626_s2 + $0x8] sm:$0xff]  ;;  %s2639_s14 = smov (!%p457_p3, %s1694_s14), 63  ;;  %vm520_vm0 = vcmask 261120   ;;  %vm1325_vm1 = vcmask 64512  }
   0xc   : > { %629 = vmatpush.msra.mxu0 %v515_v0  ;;  %v512_v3 = vld [vmem:[%s2626_s2] sm:$0xff]  ;;  %s1848_s19 = sshll.u32 %s2639_s14, 3  ;;  %v777_v13 = vld [vmem:[%s2628_s4 + $0x78] sm:$0xff]  ;;  %v776_v14 = vld [vmem:[%s2628_s4 + $0x70] sm:$0xff]  ;;  %vm1554_vm2 = vcmask 7168  }
   0xd   : > { %s1854_s22 = scalar_lea.vmem %s2624_s0, %s1848_s19  ;;  %782 = vmatpush.msra.mxu1 %v777_v13  ;;  %v775_v15 = vld [vmem:[%s2628_s4 + $0x68] sm:$0xff]  ;;  %v774_v17 = vld [vmem:[%s2628_s4 + $0x60] sm:$0xff]  ;;  %v773_v18 = vld [vmem:[%s2628_s4 + $0x58] sm:$0xff]  ;;  %s2164_s27 = scalar_lea.vmem %s2625_s1, %s1848_s19 }
   0xe   : > { %630 = vmatpush.msra.mxu0 %v514_v1  ;;  %v480_v4 = vld [vmem:[%s1854_s22] sm:$0xff]  ;;  %v481_v5 = vld [vmem:[%s1854_s22 + $0x8] sm:$0xff]  ;;  %v482_v6 = vld [vmem:[%s1854_s22 + $0x10] sm:$0xff]  ;;  %s2184_s17 = scalar_lea.vmem %s2636_s12, %s1848_s19  ;;  %s2483_s23 = scalar_lea.vmem %s2637_s13, %s1848_s19 }
   0xf   : > { %v483_v7 = vld [vmem:[%s1854_s22 + $0x18] sm:$0xff]  ;;  %v484_v8 = vld [vmem:[%s1854_s22 + $0x20] sm:$0xff]  ;;  %v485_v9 = vld [vmem:[%s1854_s22 + $0x28] sm:$0xff]  ;;  %783 = vmatpush.msra.mxu1 %v776_v14 }
  0x10   : > { %631 = vmatpush.msra.mxu0 %v513_v2  ;;  %v486_v10 = vld [vmem:[%s1854_s22 + $0x30] sm:$0xff]  ;;  %v487_v11 = vld [vmem:[%s1854_s22 + $0x38] sm:$0xff]  ;;  %v488_v12 = vld [vmem:[%s1854_s22 + $0x40] sm:$0xff] }
  0x11   : > { %v489_v16 = vld [vmem:[%s1854_s22 + $0x48] sm:$0xff]  ;;  %784 = vmatpush.msra.mxu1 %v775_v15  ;;  %v772_v19 = vld [vmem:[%s2628_s4 + $0x50] sm:$0xff]  ;;  %v770_v22 = vld [vmem:[%s2628_s4 + $0x40] sm:$0xff] }
  0x12   : > { %632 = vmatpush.msra.mxu0 %v512_v3  ;;  %v771_v20 = vld [vmem:[%s2628_s4 + $0x48] sm:$0xff]  ;;  %v490_v21 = vld [vmem:[%s1854_s22 + $0x50] sm:$0xff]  ;;  %v769_v23 = vld [vmem:[%s2628_s4 + $0x38] sm:$0xff] }
  0x13   : > { %1702 = vmatmul.msk.f32.vlgmr.msra.gmra.mxu0 %vm520_vm0, %v480_v4  ;;  %785 = vmatpush.msra.mxu1 %v774_v17  ;;  %v768_v24 = vld [vmem:[%s2628_s4 + $0x30] sm:$0xff]  ;;  %v767_v25 = vld [vmem:[%s2628_s4 + $0x28] sm:$0xff]  ;;  %v491_v26 = vld [vmem:[%s1854_s22 + $0x58] sm:$0xff] }
  0x14   : > { %v766_v27 = vld [vmem:[%s2628_s4 + $0x20] sm:$0xff]  ;;  %v765_v28 = vld [vmem:[%s2628_s4 + $0x18] sm:$0xff]  ;;  %v764_v29 = vld [vmem:[%s2628_s4 + $0x10] sm:$0xff] }
  0x15   : > { %786 = vmatpush.msra.mxu1 %v773_v18  ;;  %v492_v30 = vld [vmem:[%s1854_s22 + $0x60] sm:$0xff]  ;;  %v763_v31 = vld [vmem:[%s2628_s4 + $0x8] sm:$0xff]  ;;  %v494_v34 = vld [vmem:[%s1854_s22 + $0x70] sm:$0xff] }
  0x16   : > { %v762_v32 = vld [vmem:[%s2628_s4] sm:$0xff]  ;;  %v493_v33 = vld [vmem:[%s1854_s22 + $0x68] sm:$0xff]  ;;  %v495_v35 = vld [vmem:[%s1854_s22 + $0x78] sm:$0xff] }
  0x17   : > { %787 = vmatpush.msra.mxu1 %v772_v19  ;;  %v1939_v36 = vld [vmem:[%s2627_s3] ss:$0 sm:$0xff]  ;;  %v497_v42 = vld [vmem:[%s1854_s22 + $0x88] sm:$0xff]  ;;  %v498_v46 = vld [vmem:[%s1854_s22 + $0x90] sm:$0xff] }
  0x18   : > { %v496_v38 = vld [vmem:[%s1854_s22 + $0x80] sm:$0xff]  ;;  %v499_v50 = vld [vmem:[%s1854_s22 + $0x98] sm:$0xff]  ;;  %v501_v58 = vld [vmem:[%s1854_s22 + $0xa8] sm:$0xff] }
  0x19   : > { %788 = vmatpush.msra.mxu1 %v771_v20  ;;  %v500_v54 = vld [vmem:[%s1854_s22 + $0xa0] sm:$0xff]  ;;  %v502_v62 = vld [vmem:[%s1854_s22 + $0xb0] sm:$0xff]  ;;  %v503_v2 = vld [vmem:[%s1854_s22 + $0xb8] sm:$0xff] }
  0x1a   : > { %v941_v13 = vld [vmem:[%s2630_s6 + $0x70] sm:$0xff]  ;;  %v940_v15 = vld [vmem:[%s2630_s6 + $0x68] sm:$0xff]  ;;  %v938_v17 = vld [vmem:[%s2630_s6 + $0x58] sm:$0xff] }
  0x1b   : > { %1703 = vmatmul.msk.f32.gmra.mxu0 %vm520_vm0, %v481_v5  ;;  %789 = vmatpush.msra.mxu1 %v770_v22  ;;  %v506_v19 = vld [vmem:[%s1854_s22 + $0xd0] sm:$0xff] }
  0x1d   : > { %790 = vmatpush.msra.mxu1 %v769_v23  ;;  %v936_v23 = vld [vmem:[%s2630_s6 + $0x48] sm:$0xff] }
  0x1f   : > { %791 = vmatpush.msra.mxu1 %v768_v24  ;;  %v935_v24 = vld [vmem:[%s2630_s6 + $0x40] sm:$0xff] }
  0x21   : > { %792 = vmatpush.msra.mxu1 %v767_v25  ;;  %v934_v25 = vld [vmem:[%s2630_s6 + $0x38] sm:$0xff] }
  0x23   : > { %1704 = vmatmul.msk.f32.gmra.mxu0 %vm520_vm0, %v482_v6  ;;  %793 = vmatpush.msra.mxu1 %v766_v27  ;;  %v504_v6 = vld [vmem:[%s1854_s22 + $0xc0] sm:$0xff]  ;;  %v507_v27 = vld [vmem:[%s1854_s22 + $0xd8] sm:$0xff] }
  0x25   : > { %794 = vmatpush.msra.mxu1 %v765_v28 }
  0x27   : > { %795 = vmatpush.msra.mxu1 %v764_v29  ;;  %v933_v29 = vld [vmem:[%s2630_s6 + $0x30] sm:$0xff] }
  0x29   : > { %796 = vmatpush.msra.mxu1 %v763_v31  ;;  %v932_v31 = vld [vmem:[%s2630_s6 + $0x28] sm:$0xff] }
  0x2b   : > { %1705 = vmatmul.msk.f32.gmra.mxu0 %vm520_vm0, %v483_v7  ;;  %797 = vmatpush.msra.mxu1 %v762_v32  ;;  %v931_v32 = vld [vmem:[%s2630_s6 + $0x20] sm:$0xff] }
  0x33   : > { %1706 = vmatmul.msk.f32.gmra.mxu0 %vm520_vm0, %v484_v8 }
  0x3b   : > { %1707 = vmatmul.msk.f32.gmra.mxu0 %vm520_vm0, %v485_v9  ;;  %v942_v9 = vld [vmem:[%s2630_s6 + $0x78] sm:$0xff] }
  0x3c   : > { %947 = vmatpush.msra.mxu2 %v942_v9 }
  0x3e   : > { %948 = vmatpush.msra.mxu2 %v941_v13 }
  0x40   : > { %949 = vmatpush.msra.mxu2 %v940_v15 }
  0x43   : > { %1708 = vmatmul.msk.f32.gmra.mxu0 %vm520_vm0, %v486_v10 }
  0x4b   : > { %1709 = vmatmul.msk.f32.gmra.mxu0 %vm520_vm0, %v487_v11  ;;  %v505_v11 = vld [vmem:[%s1854_s22 + $0xc8] sm:$0xff] }
  0x53   : > { %1710 = vmatmul.msk.f32.gmra.mxu0 %vm520_vm0, %v488_v12 }
  0x5b   : > { %1711 = vmatmul.msk.f32.gmra.mxu0 %vm520_vm0, %v489_v16  ;;  %v939_v16 = vld [vmem:[%s2630_s6 + $0x60] sm:$0xff] }
  0x5c   : > { %950 = vmatpush.msra.mxu2 %v939_v16 }
  0x5e   : > { %951 = vmatpush.msra.mxu2 %v938_v17 }
  0x63   : > { %1712 = vmatmul.msk.f32.gmra.mxu0 %vm520_vm0, %v490_v21  ;;  %v937_v21 = vld [vmem:[%s2630_s6 + $0x50] sm:$0xff] }
  0x64   : > { %952 = vmatpush.msra.mxu2 %v937_v21 }
  0x66   : > { %953 = vmatpush.msra.mxu2 %v936_v23 }
  0x68   : > { %954 = vmatpush.msra.mxu2 %v935_v24 }
  0x6a   : > { %955 = vmatpush.msra.mxu2 %v934_v25 }
  0x6b   : > { %1713 = vmatmul.msk.f32.gmra.mxu0 %vm520_vm0, %v491_v26 }
  0x6c   : > { %956 = vmatpush.msra.mxu2 %v933_v29 }
  0x6e   : > { %957 = vmatpush.msra.mxu2 %v932_v31 }
  0x70   : > { %958 = vmatpush.msra.mxu2 %v931_v32 }
  0x73   : > { %1714 = vmatmul.msk.f32.gmra.mxu0 %vm520_vm0, %v492_v30 }
  0x7b   : > { %1715 = vmatmul.msk.f32.gmra.mxu0 %vm520_vm0, %v493_v33  ;;  %v930_v33 = vld [vmem:[%s2630_s6 + $0x18] sm:$0xff] }
  0x7c   : > { %959 = vmatpush.msra.mxu2 %v930_v33 }
  0x83   : > { %1716 = vmatmul.msk.f32.gmra.mxu0 %vm520_vm0, %v494_v34 }
  0x8b   : > { %1717 = vmatmul.msk.f32.gmra.mxu0 %vm520_vm0, %v495_v35  ;;  %v508_v35 = vld [vmem:[%s1854_s22 + $0xe0] sm:$0xff] }
  0x90   : > { %v634_v37 = vpop.f32.mrf.mxu0 }
  0x91   : > { %v635_v39 = vadd.f32 %v1939_v36, %v634_v37 }
  0x93   : > { %1718 = vmatmul.msk.f32.gmra.mxu0 %vm520_vm0, %v496_v38  ;;  %v730_v40 = vmax.f32 %v635_v39, 0.0  ;;  %v929_v38 = vld [vmem:[%s2630_s6 + $0x10] sm:$0xff] }
  0x94   : > { %960 = vmatpush.msra.mxu2 %v929_v38 }
  0x95   : > { %798 = vmatmul.f32.vlgmr.msra.gmra.mxu1 %v730_v40  ;;  %v928_v40 = vld [vmem:[%s2630_s6 + $0x8] sm:$0xff] }
  0x96   : > { %961 = vmatpush.msra.mxu2 %v928_v40 }
  0x98   : > { %v637_v41 = vpop.f32.mrf.mxu0 }
  0x99   : > { %v638_v43 = vadd.f32 %v1939_v36, %v637_v41  ;;  %v927_v41 = vld [vmem:[%s2630_s6] sm:$0xff] }
  0x9a   : > { %962 = vmatpush.msra.mxu2 %v927_v41 }
  0x9b   : > { %1719 = vmatmul.msk.f32.gmra.mxu0 %vm520_vm0, %v497_v42  ;;  %v731_v44 = vmax.f32 %v638_v43, 0.0  ;;  %v509_v43 = vld [vmem:[%s1854_s22 + $0xe8] sm:$0xff] }
  0x9d   : > { %801 = vmatmul.f32.gmra.mxu1 %v731_v44 }
  0xa0   : > { %v640_v45 = vpop.f32.mrf.mxu0 }
  0xa1   : > { %v641_v47 = vadd.f32 %v1939_v36, %v640_v45 }
  0xa3   : > { %1720 = vmatmul.msk.f32.gmra.mxu0 %vm520_vm0, %v498_v46  ;;  %v732_v48 = vmax.f32 %v641_v47, 0.0  ;;  %v510_v47 = vld [vmem:[%s1854_s22 + $0xf0] sm:$0xff] }
  0xa5   : > { %804 = vmatmul.f32.gmra.mxu1 %v732_v48 }
  0xa8   : > { %v643_v49 = vpop.f32.mrf.mxu0 }
  0xa9   : > { %v644_v51 = vadd.f32 %v1939_v36, %v643_v49 }
  0xab   : > { %1721 = vmatmul.msk.f32.gmra.mxu0 %vm520_vm0, %v499_v50  ;;  %v733_v52 = vmax.f32 %v644_v51, 0.0  ;;  %v511_v51 = vld [vmem:[%s1854_s22 + $0xf8] sm:$0xff] }
  0xad   : > { %807 = vmatmul.f32.gmra.mxu1 %v733_v52 }
  0xb0   : > { %v646_v53 = vpop.f32.mrf.mxu0 }
  0xb1   : > { %v647_v55 = vadd.f32 %v1939_v36, %v646_v53 }
  0xb3   : > { %1722 = vmatmul.msk.f32.gmra.mxu0 %vm520_vm0, %v500_v54  ;;  %v734_v56 = vmax.f32 %v647_v55, 0.0  ;;  %v2040_v54 = vld [vmem:[%s2629_s5] ss:$0 sm:$0xff] }
  0xb5   : > { %810 = vmatmul.f32.gmra.mxu1 %v734_v56 }
  0xb8   : > { %v649_v57 = vpop.f32.mrf.mxu0 }
  0xb9   : > { %v650_v59 = vadd.f32 %v1939_v36, %v649_v57 }
  0xbb   : > { %1723 = vmatmul.msk.f32.gmra.mxu0 %vm520_vm0, %v501_v58  ;;  %v735_v60 = vmax.f32 %v650_v59, 0.0 }
  0xbd   : > { %813 = vmatmul.f32.gmra.mxu1 %v735_v60 }
  0xc0   : > { %v652_v61 = vpop.f32.mrf.mxu0 }
  0xc1   : > { %v653_v63 = vadd.f32 %v1939_v36, %v652_v61 }
  0xc3   : > { %1724 = vmatmul.msk.f32.gmra.mxu0 %vm520_vm0, %v502_v62  ;;  %v736_v0 = vmax.f32 %v653_v63, 0.0 }
  0xc5   : > { %816 = vmatmul.f32.gmra.mxu1 %v736_v0 }
  0xc8   : > { %v655_v1 = vpop.f32.mrf.mxu0 }
  0xc9   : > { %v656_v3 = vadd.f32 %v1939_v36, %v655_v1 }
  0xcb   : > { %1725 = vmatmul.msk.f32.gmra.mxu0 %vm520_vm0, %v503_v2  ;;  %v737_v4 = vmax.f32 %v656_v3, 0.0 }
  0xcd   : > { %819 = vmatmul.f32.gmra.mxu1 %v737_v4 }
  0xd0   : > { %v658_v5 = vpop.f32.mrf.mxu0 }
  0xd1   : > { %v659_v7 = vadd.f32 %v1939_v36, %v658_v5 }
  0xd3   : > { %v738_v8 = vmax.f32 %v659_v7, 0.0  ;;  %1726 = vmatmul.msk.f32.gmra.mxu0 %vm520_vm0, %v504_v6 }
  0xd5   : > { %822 = vmatmul.f32.gmra.mxu1 %v738_v8 }
  0xd8   : > { %v661_v10 = vpop.f32.mrf.mxu0 }
  0xd9   : > { %v662_v12 = vadd.f32 %v1939_v36, %v661_v10 }
  0xdb   : > { %v739_v14 = vmax.f32 %v662_v12, 0.0  ;;  %1727 = vmatmul.msk.f32.gmra.mxu0 %vm520_vm0, %v505_v11 }
  0xdd   : > { %825 = vmatmul.f32.gmra.mxu1 %v739_v14 }
  0xe0   : > { %v664_v18 = vpop.f32.mrf.mxu0 }
  0xe1   : > { %v665_v20 = vadd.f32 %v1939_v36, %v664_v18 }
  0xe3   : > { %v740_v22 = vmax.f32 %v665_v20, 0.0  ;;  %1728 = vmatmul.msk.f32.gmra.mxu0 %vm520_vm0, %v506_v19 }
  0xe5   : > { %828 = vmatmul.f32.gmra.mxu1 %v740_v22 }
  0xe8   : > { %v667_v26 = vpop.f32.mrf.mxu0 }
  0xe9   : > { %v668_v28 = vadd.f32 %v1939_v36, %v667_v26 }
  0xeb   : > { %v741_v30 = vmax.f32 %v668_v28, 0.0  ;;  %1729 = vmatmul.msk.f32.gmra.mxu0 %vm520_vm0, %v507_v27 }
  0xed   : > { %831 = vmatmul.f32.gmra.mxu1 %v741_v30 }
  0xf0   : > { %v670_v34 = vpop.f32.mrf.mxu0 }
  0xf1   : > { %v671_v37 = vadd.f32 %v1939_v36, %v670_v34 }
  0xf3   : > { %v742_v39 = vmax.f32 %v671_v37, 0.0  ;;  %1730 = vmatmul.msk.f32.gmra.mxu0 %vm520_vm0, %v508_v35 }
  0xf5   : > { %834 = vmatmul.f32.gmra.mxu1 %v742_v39 }
  0xf8   : > { %v673_v42 = vpop.f32.mrf.mxu0 }
  0xf9   : > { %v674_v44 = vadd.f32 %v1939_v36, %v673_v42 }
  0xfb   : > { %v743_v45 = vmax.f32 %v674_v44, 0.0  ;;  %1731 = vmatmul.msk.f32.gmra.mxu0 %vm520_vm0, %v509_v43 }
  0xfd   : > { %837 = vmatmul.f32.gmra.mxu1 %v743_v45 }
 0x100   : > { %v676_v46 = vpop.f32.mrf.mxu0 }
 0x101   : > { %v677_v48 = vadd.f32 %v1939_v36, %v676_v46 }
 0x103   : > { %v744_v49 = vmax.f32 %v677_v48, 0.0  ;;  %1732 = vmatmul.msk.f32.gmra.mxu0 %vm520_vm0, %v510_v47 }
 0x105   : > { %840 = vmatmul.f32.gmra.mxu1 %v744_v49 }
 0x108   : > { %v679_v50 = vpop.f32.mrf.mxu0 }
 0x109   : > { %v680_v52 = vadd.f32 %v1939_v36, %v679_v50 }
 0x10b   : > { %v745_v53 = vmax.f32 %v680_v52, 0.0  ;;  %1733 = vmatmul.msk.f32.gmra.mxu0 %vm520_vm0, %v511_v51  ;;  %v1107_v52 = vld [vmem:[%s2632_s8 + $0x78] sm:$0xff] }
 0x10c   : > { %1112 = vmatpush.msra.mxu3 %v1107_v52 }
 0x10d   : > { %843 = vmatmul.f32.gmra.mxu1 %v745_v53 }
 0x110   : > { %v682_v55 = vpop.f32.mrf.mxu0 }
 0x111   : > { %v683_v56 = vadd.f32 %v1939_v36, %v682_v55 }
 0x112   : > { %v799_v57 = vpop.f32.mrf.mxu1 }
 0x113   : > { %v746_v58 = vmax.f32 %v683_v56, 0.0  ;;  %v800_v59 = vadd.f32 %v2040_v54, %v799_v57  ;;  %v1106_v56 = vld [vmem:[%s2632_s8 + $0x70] sm:$0xff] }
 0x114   : > { %1113 = vmatpush.msra.mxu3 %v1106_v56 }
 0x115   : > { %846 = vmatmul.f32.gmra.mxu1 %v746_v58  ;;  %v895_v60 = vmax.f32 %v800_v59, 0.0 }
 0x117   : > { %963 = vmatmul.f32.vlgmr.msra.gmra.mxu2 %v895_v60  ;;  %v1105_v60 = vld [vmem:[%s2632_s8 + $0x68] sm:$0xff] }
 0x118   : > { %v685_v61 = vpop.f32.mrf.mxu0  ;;  %1114 = vmatpush.msra.mxu3 %v1105_v60 }
 0x119   : > { %v686_v62 = vadd.f32 %v1939_v36, %v685_v61 }
 0x11a   : > { %v802_v63 = vpop.f32.mrf.mxu1 }
 0x11b   : > { %v747_v0 = vmax.f32 %v686_v62, 0.0  ;;  %v803_v1 = vadd.f32 %v2040_v54, %v802_v63  ;;  %v1104_v62 = vld [vmem:[%s2632_s8 + $0x60] sm:$0xff]  ;;  %v1103_v63 = vld [vmem:[%s2632_s8 + $0x58] sm:$0xff] }
 0x11c   : > { %1115 = vmatpush.msra.mxu3 %v1104_v62 }
 0x11d   : > { %849 = vmatmul.f32.gmra.mxu1 %v747_v0  ;;  %v896_v2 = vmax.f32 %v803_v1, 0.0 }
 0x11e   : > { %1116 = vmatpush.msra.mxu3 %v1103_v63 }
 0x11f   : > { %966 = vmatmul.f32.gmra.mxu2 %v896_v2  ;;  %v1102_v2 = vld [vmem:[%s2632_s8 + $0x50] sm:$0xff] }
 0x120   : > { %v688_v3 = vpop.f32.mrf.mxu0  ;;  %1117 = vmatpush.msra.mxu3 %v1102_v2 }
 0x121   : > { %v689_v4 = vadd.f32 %v1939_v36, %v688_v3 }
 0x122   : > { %v805_v5 = vpop.f32.mrf.mxu1 }
 0x123   : > { %v748_v6 = vmax.f32 %v689_v4, 0.0  ;;  %v806_v7 = vadd.f32 %v2040_v54, %v805_v5 }
 0x125   : > { %852 = vmatmul.f32.gmra.mxu1 %v748_v6  ;;  %v897_v8 = vmax.f32 %v806_v7, 0.0  ;;  %v1101_v6 = vld [vmem:[%s2632_s8 + $0x48] sm:$0xff] }
 0x126   : > { %1118 = vmatpush.msra.mxu3 %v1101_v6 }
 0x127   : > { %969 = vmatmul.f32.gmra.mxu2 %v897_v8  ;;  %v1100_v8 = vld [vmem:[%s2632_s8 + $0x40] sm:$0xff] }
 0x128   : > { %v691_v9 = vpop.f32.mrf.mxu0  ;;  %1119 = vmatpush.msra.mxu3 %v1100_v8 }
 0x129   : > { %v692_v10 = vadd.f32 %v1939_v36, %v691_v9  ;;  %v1099_v9 = vld [vmem:[%s2632_s8 + $0x38] sm:$0xff] }
 0x12a   : > { %v808_v11 = vpop.f32.mrf.mxu1  ;;  %1120 = vmatpush.msra.mxu3 %v1099_v9 }
 0x12b   : > { %v749_v12 = vmax.f32 %v692_v10, 0.0  ;;  %v809_v13 = vadd.f32 %v2040_v54, %v808_v11 }
 0x12d   : > { %855 = vmatmul.f32.gmra.mxu1 %v749_v12  ;;  %v898_v14 = vmax.f32 %v809_v13, 0.0  ;;  %v1098_v12 = vld [vmem:[%s2632_s8 + $0x30] sm:$0xff] }
 0x12e   : > { %1121 = vmatpush.msra.mxu3 %v1098_v12 }
 0x12f   : > { %972 = vmatmul.f32.gmra.mxu2 %v898_v14 }
 0x130   : > { %v694_v15 = vpop.f32.mrf.mxu0 }
 0x131   : > { %v695_v16 = vadd.f32 %v1939_v36, %v694_v15 }
 0x132   : > { %v811_v17 = vpop.f32.mrf.mxu1 }
 0x133   : > { %v750_v18 = vmax.f32 %v695_v16, 0.0  ;;  %v812_v19 = vadd.f32 %v2040_v54, %v811_v17  ;;  %v1097_v16 = vld [vmem:[%s2632_s8 + $0x28] sm:$0xff] }
 0x134   : > { %1122 = vmatpush.msra.mxu3 %v1097_v16 }
 0x135   : > { %858 = vmatmul.f32.gmra.mxu1 %v750_v18  ;;  %v899_v20 = vmax.f32 %v812_v19, 0.0  ;;  %v1096_v18 = vld [vmem:[%s2632_s8 + $0x20] sm:$0xff]  ;;  %v1095_v19 = vld [vmem:[%s2632_s8 + $0x18] sm:$0xff] }
 0x136   : > { %1123 = vmatpush.msra.mxu3 %v1096_v18 }
 0x137   : > { %975 = vmatmul.f32.gmra.mxu2 %v899_v20 }
 0x138   : > { %v697_v21 = vpop.f32.mrf.mxu0  ;;  %1124 = vmatpush.msra.mxu3 %v1095_v19 }
 0x139   : > { %v698_v22 = vadd.f32 %v1939_v36, %v697_v21 }
 0x13a   : > { %v814_v23 = vpop.f32.mrf.mxu1 }
 0x13b   : > { %v751_v24 = vmax.f32 %v698_v22, 0.0  ;;  %v815_v25 = vadd.f32 %v2040_v54, %v814_v23  ;;  %v1094_v22 = vld [vmem:[%s2632_s8 + $0x10] sm:$0xff] }
 0x13c   : > { %1125 = vmatpush.msra.mxu3 %v1094_v22 }
 0x13d   : > { %861 = vmatmul.f32.gmra.mxu1 %v751_v24  ;;  %v900_v26 = vmax.f32 %v815_v25, 0.0 }
 0x13f   : > { %978 = vmatmul.f32.gmra.mxu2 %v900_v26  ;;  %v1093_v26 = vld [vmem:[%s2632_s8 + $0x8] sm:$0xff] }
 0x140   : > { %v700_v27 = vpop.f32.mrf.mxu0  ;;  %1126 = vmatpush.msra.mxu3 %v1093_v26 }
 0x141   : > { %v701_v28 = vadd.f32 %v1939_v36, %v700_v27 }
 0x142   : > { %v817_v29 = vpop.f32.mrf.mxu1 }
 0x143   : > { %v752_v30 = vmax.f32 %v701_v28, 0.0  ;;  %v818_v31 = vadd.f32 %v2040_v54, %v817_v29  ;;  %v1092_v28 = vld [vmem:[%s2632_s8] sm:$0xff] }
 0x144   : > { %1127 = vmatpush.msra.mxu3 %v1092_v28 }
 0x145   : > { %864 = vmatmul.f32.gmra.mxu1 %v752_v30  ;;  %v901_v32 = vmax.f32 %v818_v31, 0.0 }
 0x147   : > { %981 = vmatmul.f32.gmra.mxu2 %v901_v32 }
 0x148   : > { %v703_v33 = vpop.f32.mrf.mxu0 }
 0x149   : > { %v704_v34 = vadd.f32 %v1939_v36, %v703_v33 }
 0x14a   : > { %v820_v35 = vpop.f32.mrf.mxu1 }
 0x14b   : > { %v753_v37 = vmax.f32 %v704_v34, 0.0  ;;  %v821_v38 = vadd.f32 %v2040_v54, %v820_v35 }
 0x14d   : > { %867 = vmatmul.f32.gmra.mxu1 %v753_v37  ;;  %v902_v39 = vmax.f32 %v821_v38, 0.0 }
 0x14f   : > { %984 = vmatmul.f32.gmra.mxu2 %v902_v39 }
 0x150   : > { %v706_v40 = vpop.f32.mrf.mxu0 }
 0x151   : > { %v707_v41 = vadd.f32 %v1939_v36, %v706_v40 }
 0x152   : > { %v823_v42 = vpop.f32.mrf.mxu1 }
 0x153   : > { %v754_v43 = vmax.f32 %v707_v41, 0.0  ;;  %v824_v44 = vadd.f32 %v2040_v54, %v823_v42 }
 0x155   : > { %v903_v45 = vmax.f32 %v824_v44, 0.0  ;;  %870 = vmatmul.f32.gmra.mxu1 %v754_v43 }
 0x157   : > { %987 = vmatmul.f32.gmra.mxu2 %v903_v45  ;;  %v2126_v45 = vld [vmem:[%s2631_s7] ss:$0 sm:$0xff] }
 0x158   : > { %v709_v46 = vpop.f32.mrf.mxu0 }
 0x159   : > { %v710_v47 = vadd.f32 %v1939_v36, %v709_v46 }
 0x15a   : > { %v826_v48 = vpop.f32.mrf.mxu1 }
 0x15b   : > { %v755_v49 = vmax.f32 %v710_v47, 0.0  ;;  %v827_v50 = vadd.f32 %v2040_v54, %v826_v48 }
 0x15d   : > { %v904_v51 = vmax.f32 %v827_v50, 0.0  ;;  %873 = vmatmul.f32.gmra.mxu1 %v755_v49 }
 0x15f   : > { %990 = vmatmul.f32.gmra.mxu2 %v904_v51 }
 0x160   : > { %v712_v53 = vpop.f32.mrf.mxu0 }
 0x161   : > { %v713_v55 = vadd.f32 %v1939_v36, %v712_v53 }
 0x162   : > { %v829_v57 = vpop.f32.mrf.mxu1 }
 0x163   : > { %v756_v58 = vmax.f32 %v713_v55, 0.0  ;;  %v830_v59 = vadd.f32 %v2040_v54, %v829_v57 }
 0x165   : > { %v905_v61 = vmax.f32 %v830_v59, 0.0  ;;  %876 = vmatmul.f32.gmra.mxu1 %v756_v58 }
 0x167   : > { %993 = vmatmul.f32.gmra.mxu2 %v905_v61 }
 0x168   : > { %v715_v0 = vpop.f32.mrf.mxu0 }
 0x169   : > { %v716_v1 = vadd.f32 %v1939_v36, %v715_v0 }
 0x16a   : > { %v832_v3 = vpop.f32.mrf.mxu1 }
 0x16b   : > { %v757_v4 = vmax.f32 %v716_v1, 0.0  ;;  %v833_v5 = vadd.f32 %v2040_v54, %v832_v3 }
 0x16d   : > { %v906_v7 = vmax.f32 %v833_v5, 0.0  ;;  %879 = vmatmul.f32.gmra.mxu1 %v757_v4 }
 0x16f   : > { %996 = vmatmul.f32.gmra.mxu2 %v906_v7 }
 0x170   : > { %v718_v10 = vpop.f32.mrf.mxu0 }
 0x171   : > { %v719_v11 = vadd.f32 %v1939_v36, %v718_v10 }
 0x172   : > { %v835_v13 = vpop.f32.mrf.mxu1 }
 0x173   : > { %v758_v14 = vmax.f32 %v719_v11, 0.0  ;;  %v836_v15 = vadd.f32 %v2040_v54, %v835_v13 }
 0x175   : > { %v907_v17 = vmax.f32 %v836_v15, 0.0  ;;  %882 = vmatmul.f32.gmra.mxu1 %v758_v14 }
 0x177   : > { %999 = vmatmul.f32.gmra.mxu2 %v907_v17 }
 0x178   : > { %v721_v20 = vpop.f32.mrf.mxu0 }
 0x179   : > { %v722_v21 = vadd.f32 %v1939_v36, %v721_v20 }
 0x17a   : > { %v838_v23 = vpop.f32.mrf.mxu1 }
 0x17b   : > { %v759_v24 = vmax.f32 %v722_v21, 0.0  ;;  %v839_v25 = vadd.f32 %v2040_v54, %v838_v23 }
 0x17d   : > { %v908_v27 = vmax.f32 %v839_v25, 0.0  ;;  %885 = vmatmul.f32.gmra.mxu1 %v759_v24 }
 0x17f   : > { %1002 = vmatmul.f32.gmra.mxu2 %v908_v27 }
 0x180   : > { %v724_v29 = vpop.f32.mrf.mxu0 }
 0x181   : > { %v725_v30 = vadd.f32 %v1939_v36, %v724_v29 }
 0x182   : > { %v841_v31 = vpop.f32.mrf.mxu1 }
 0x183   : > { %v760_v32 = vmax.f32 %v725_v30, 0.0  ;;  %v842_v33 = vadd.f32 %v2040_v54, %v841_v31 }
 0x185   : > { %v909_v34 = vmax.f32 %v842_v33, 0.0  ;;  %888 = vmatmul.f32.gmra.mxu1 %v760_v32 }
 0x187   : > { %1005 = vmatmul.f32.gmra.mxu2 %v909_v34 }
 0x188   : > { %v727_v35 = vpop.f32.mrf.mxu0 }
 0x189   : > { %v728_v37 = vadd.f32 %v1939_v36, %v727_v35 }
 0x18a   : > { %v844_v38 = vpop.f32.mrf.mxu1 }
 0x18b   : > { %v761_v39 = vmax.f32 %v728_v37, 0.0  ;;  %v845_v40 = vadd.f32 %v2040_v54, %v844_v38 }
 0x18d   : > { %v910_v41 = vmax.f32 %v845_v40, 0.0  ;;  %891 = vmatmul.f32.gmra.mxu1 %v761_v39 }
 0x18f   : > { %1008 = vmatmul.f32.gmra.mxu2 %v910_v41 }
 0x192   : > { %v847_v42 = vpop.f32.mrf.mxu1 }
 0x193   : > { %v848_v43 = vadd.f32 %v2040_v54, %v847_v42 }
 0x195   : > { %v911_v44 = vmax.f32 %v848_v43, 0.0 }
 0x197   : > { %1011 = vmatmul.f32.gmra.mxu2 %v911_v44 }
 0x19a   : > { %v850_v46 = vpop.f32.mrf.mxu1  ;;  %v964_v47 = vpop.f32.mrf.mxu2 }
 0x19b   : > { %v851_v36 = vadd.f32 %v2040_v54, %v850_v46  ;;  %v965_v48 = vadd.f32 %v2126_v45, %v964_v47 }
 0x19d   : > { %v912_v49 = vmax.f32 %v851_v36, 0.0  ;;  %v1060_v50 = vmax.f32 %v965_v48, 0.0 }
 0x19f   : > { %1014 = vmatmul.f32.gmra.mxu2 %v912_v49  ;;  %1128 = vmatmul.f32.vlgmr.msra.gmra.mxu3 %v1060_v50 }
 0x1a2   : > { %v853_v51 = vpop.f32.mrf.mxu1  ;;  %v967_v52 = vpop.f32.mrf.mxu2 }
 0x1a3   : > { %v854_v53 = vadd.f32 %v2040_v54, %v853_v51  ;;  %v968_v55 = vadd.f32 %v2126_v45, %v967_v52 }
 0x1a5   : > { %v913_v56 = vmax.f32 %v854_v53, 0.0  ;;  %v1061_v57 = vmax.f32 %v968_v55, 0.0 }
 0x1a7   : > { %1017 = vmatmul.f32.gmra.mxu2 %v913_v56  ;;  %1131 = vmatmul.f32.gmra.mxu3 %v1061_v57 }
 0x1aa   : > { %v856_v58 = vpop.f32.mrf.mxu1  ;;  %v970_v59 = vpop.f32.mrf.mxu2 }
 0x1ab   : > { %v857_v60 = vadd.f32 %v2040_v54, %v856_v58  ;;  %v971_v61 = vadd.f32 %v2126_v45, %v970_v59 }
 0x1ad   : > { %v914_v62 = vmax.f32 %v857_v60, 0.0  ;;  %v1062_v63 = vmax.f32 %v971_v61, 0.0 }
 0x1af   : > { %1020 = vmatmul.f32.gmra.mxu2 %v914_v62  ;;  %1134 = vmatmul.f32.gmra.mxu3 %v1062_v63 }
 0x1b2   : > { %v859_v0 = vpop.f32.mrf.mxu1  ;;  %v973_v1 = vpop.f32.mrf.mxu2 }
 0x1b3   : > { %v860_v2 = vadd.f32 %v2040_v54, %v859_v0  ;;  %v974_v3 = vadd.f32 %v2126_v45, %v973_v1 }
 0x1b5   : > { %v915_v4 = vmax.f32 %v860_v2, 0.0  ;;  %v1063_v5 = vmax.f32 %v974_v3, 0.0 }
 0x1b7   : > { %1023 = vmatmul.f32.gmra.mxu2 %v915_v4  ;;  %1137 = vmatmul.f32.gmra.mxu3 %v1063_v5 }
 0x1ba   : > { %v862_v6 = vpop.f32.mrf.mxu1  ;;  %v976_v7 = vpop.f32.mrf.mxu2 }
 0x1bb   : > { %v863_v8 = vadd.f32 %v2040_v54, %v862_v6  ;;  %v977_v9 = vadd.f32 %v2126_v45, %v976_v7 }
 0x1bd   : > { %v916_v10 = vmax.f32 %v863_v8, 0.0  ;;  %v1064_v11 = vmax.f32 %v977_v9, 0.0 }
 0x1bf   : > { %1026 = vmatmul.f32.gmra.mxu2 %v916_v10  ;;  %1140 = vmatmul.f32.gmra.mxu3 %v1064_v11 }
 0x1c2   : > { %v865_v12 = vpop.f32.mrf.mxu1  ;;  %v979_v13 = vpop.f32.mrf.mxu2 }
 0x1c3   : > { %v866_v14 = vadd.f32 %v2040_v54, %v865_v12  ;;  %v980_v15 = vadd.f32 %v2126_v45, %v979_v13 }
 0x1c5   : > { %v917_v16 = vmax.f32 %v866_v14, 0.0  ;;  %v1065_v17 = vmax.f32 %v980_v15, 0.0  ;;  %v2169_v15 = vld [vmem:[%s2634_s10] ss:$0 sm:$0xff] }
 0x1c7   : > { %1029 = vmatmul.f32.gmra.mxu2 %v917_v16  ;;  %1143 = vmatmul.f32.gmra.mxu3 %v1065_v17  ;;  %v1225_v16 = vld [vmem:[%s2164_s27] sm:$0xff] }
 0x1c8   : > { %v2175_v17 = vld [vmem:[%s2633_s9] ss:$0 sm:$0xff] }
 0x1ca   : > { %v868_v18 = vpop.f32.mrf.mxu1  ;;  %v982_v19 = vpop.f32.mrf.mxu2 }
 0x1cb   : > { %v869_v20 = vadd.f32 %v2040_v54, %v868_v18  ;;  %v983_v21 = vadd.f32 %v2126_v45, %v982_v19  ;;  %v1261_v18 = vmul.f32 %v2169_v15, %v1225_v16 }
 0x1cd   : > { %v918_v22 = vmax.f32 %v869_v20, 0.0  ;;  %v1066_v23 = vmax.f32 %v983_v21, 0.0 }
 0x1cf   : > { %1032 = vmatmul.f32.gmra.mxu2 %v918_v22  ;;  %1146 = vmatmul.f32.gmra.mxu3 %v1066_v23 }
 0x1d2   : > { %v871_v24 = vpop.f32.mrf.mxu1  ;;  %v985_v25 = vpop.f32.mrf.mxu2 }
 0x1d3   : > { %v872_v26 = vadd.f32 %v2040_v54, %v871_v24  ;;  %v986_v27 = vadd.f32 %v2126_v45, %v985_v25  ;;  %v1226_v25 = vld [vmem:[%s2164_s27 + $0x8] sm:$0xff] }
 0x1d5   : > { %v919_v28 = vmax.f32 %v872_v26, 0.0  ;;  %v1067_v29 = vmax.f32 %v986_v27, 0.0  ;;  %v1262_v26 = vmul.f32 %v2169_v15, %v1226_v25 }
 0x1d7   : > { %1035 = vmatmul.f32.gmra.mxu2 %v919_v28  ;;  %1149 = vmatmul.f32.gmra.mxu3 %v1067_v29 }
 0x1da   : > { %v874_v30 = vpop.f32.mrf.mxu1  ;;  %v988_v31 = vpop.f32.mrf.mxu2 }
 0x1db   : > { %v875_v32 = vadd.f32 %v2040_v54, %v874_v30  ;;  %v989_v33 = vadd.f32 %v2126_v45, %v988_v31 }
 0x1dd   : > { %v920_v34 = vmax.f32 %v875_v32, 0.0  ;;  %v1068_v35 = vmax.f32 %v989_v33, 0.0  ;;  %v1227_v33 = vld [vmem:[%s2164_s27 + $0x10] sm:$0xff] }
 0x1df   : > { %1038 = vmatmul.f32.gmra.mxu2 %v920_v34  ;;  %1152 = vmatmul.f32.gmra.mxu3 %v1068_v35  ;;  %v1263_v34 = vmul.f32 %v2169_v15, %v1227_v33 }
 0x1e2   : > { %v877_v37 = vpop.f32.mrf.mxu1  ;;  %v991_v38 = vpop.f32.mrf.mxu2 }
 0x1e3   : > { %v878_v39 = vadd.f32 %v2040_v54, %v877_v37  ;;  %v992_v40 = vadd.f32 %v2126_v45, %v991_v38 }
 0x1e5   : > { %v921_v41 = vmax.f32 %v878_v39, 0.0  ;;  %v1069_v42 = vmax.f32 %v992_v40, 0.0  ;;  %v1360_v40 = vmul.f32 -0.5, %v1227_v33 }
 0x1e7   : > { %1041 = vmatmul.f32.gmra.mxu2 %v921_v41  ;;  %1155 = vmatmul.f32.gmra.mxu3 %v1069_v42  ;;  %v1358_v41 = vmul.f32 -0.5, %v1225_v16 }
 0x1ea   : > { %v880_v43 = vpop.f32.mrf.mxu1  ;;  %v994_v44 = vpop.f32.mrf.mxu2 }
 0x1eb   : > { %v881_v46 = vadd.f32 %v2040_v54, %v880_v43  ;;  %v995_v47 = vadd.f32 %v2126_v45, %v994_v44  ;;  %v1228_v44 = vld [vmem:[%s2164_s27 + $0x18] sm:$0xff] }
 0x1ed   : > { %v922_v36 = vmax.f32 %v881_v46, 0.0  ;;  %v1070_v48 = vmax.f32 %v995_v47, 0.0  ;;  %v1392_v46 = vmul.f32 %v1360_v40, %v1227_v33  ;;  %v2202_v47 = vld [vmem:[%s2635_s11] ss:$0 sm:$0xff]  ;;  %v2250_v40 = vld [vmem:[%s2164_s27 + $0x50] sm:$0xff] }
 0x1ef   : > { %1044 = vmatmul.f32.gmra.mxu2 %v922_v36  ;;  %1158 = vmatmul.f32.gmra.mxu3 %v1070_v48  ;;  %v1390_v36 = vmul.f32 %v1358_v41, %v1225_v16  ;;  %v1428_v48 = vadd.f32 %v2202_v47, %v1392_v46  ;;  %v2228_v16 = vld [vmem:[%s2164_s27 + $0x38] sm:$0xff] }
 0x1f2   : > { %v883_v49 = vpop.f32.mrf.mxu1  ;;  %v997_v50 = vpop.f32.mrf.mxu2 }
 0x1f3   : > { %v884_v51 = vadd.f32 %v2040_v54, %v883_v49  ;;  %v998_v52 = vadd.f32 %v2126_v45, %v997_v50  ;;  %v1426_v49 = vadd.f32 %v2202_v47, %v1390_v36  ;;  %v1264_v50 = vmul.f32 %v2169_v15, %v1228_v44 }
 0x1f5   : > { %v923_v53 = vmax.f32 %v884_v51, 0.0  ;;  %v1071_v55 = vmax.f32 %v998_v52, 0.0 }
 0x1f7   : > { %1047 = vmatmul.f32.gmra.mxu2 %v923_v53  ;;  %1161 = vmatmul.f32.gmra.mxu3 %v1071_v55  ;;  %v1464_v53 = vsel %vm1325_vm1, %v1428_v48, 0.0  ;;  %v1458_v55 = vsel %vm1325_vm1, %v1426_v49, 0.0 }
 0x1f8   : > { %1465 = vadd.xlane.f32.xlu1 %v1464_v53  ;;  %1459 = vadd.xlane.f32.xlu0 %v1458_v55 }
 0x1fa   : > { %v886_v56 = vpop.f32.mrf.mxu1  ;;  %v1000_v57 = vpop.f32.mrf.mxu2 }
 0x1fb   : > { %v887_v58 = vadd.f32 %v2040_v54, %v886_v56  ;;  %v1001_v59 = vadd.f32 %v2126_v45, %v1000_v57 }
 0x1fd   : > { %v924_v60 = vmax.f32 %v887_v58, 0.0  ;;  %v1072_v61 = vmax.f32 %v1001_v59, 0.0  ;;  %v1229_v58 = vld [vmem:[%s2164_s27 + $0x20] sm:$0xff] }
 0x1fe   : > { %v1362_v59 = vmul.f32 -0.5, %v1229_v58 }
 0x1ff   : > { %1050 = vmatmul.f32.gmra.mxu2 %v924_v60  ;;  %1164 = vmatmul.f32.gmra.mxu3 %v1072_v61  ;;  %v1361_v60 = vmul.f32 -0.5, %v1228_v44  ;;  %v1359_v61 = vmul.f32 -0.5, %v1226_v25 }
 0x202   : > { %v889_v62 = vpop.f32.mrf.mxu1  ;;  %v1003_v63 = vpop.f32.mrf.mxu2 }
 0x203   : > { %v890_v0 = vadd.f32 %v2040_v54, %v889_v62  ;;  %v1004_v1 = vadd.f32 %v2126_v45, %v1003_v63 }
 0x205   : > { %v925_v2 = vmax.f32 %v890_v0, 0.0  ;;  %v1073_v3 = vmax.f32 %v1004_v1, 0.0  ;;  %v1394_v0 = vmul.f32 %v1362_v59, %v1229_v58  ;;  %v1393_v1 = vmul.f32 %v1361_v60, %v1228_v44 }
 0x207   : > { %1053 = vmatmul.f32.gmra.mxu2 %v925_v2  ;;  %1167 = vmatmul.f32.gmra.mxu3 %v1073_v3  ;;  %v1391_v2 = vmul.f32 %v1359_v61, %v1226_v25  ;;  %v1430_v3 = vadd.f32 %v2202_v47, %v1394_v0  ;;  %v2276_v0 = vld [vmem:[%s2164_s27 + $0x60] sm:$0xff] }
 0x20a   : > { %v892_v4 = vpop.f32.mrf.mxu1  ;;  %v1006_v5 = vpop.f32.mrf.mxu2 }
 0x20b   : > { %v893_v6 = vadd.f32 %v2040_v54, %v892_v4  ;;  %v1007_v7 = vadd.f32 %v2126_v45, %v1006_v5  ;;  %v1429_v4 = vadd.f32 %v2202_v47, %v1393_v1  ;;  %v1427_v5 = vadd.f32 %v2202_v47, %v1391_v2 }
 0x20d   : > { %v926_v8 = vmax.f32 %v893_v6, 0.0  ;;  %v1074_v9 = vmax.f32 %v1007_v7, 0.0  ;;  %v1265_v6 = vmul.f32 %v2169_v15, %v1229_v58 }
 0x20f   : > { %1056 = vmatmul.f32.gmra.mxu2 %v926_v8  ;;  %1170 = vmatmul.f32.gmra.mxu3 %v1074_v9  ;;  %v1470_v9 = vsel %vm1325_vm1, %v1430_v3, 0.0  ;;  %v1370_v3 = vmul.f32 -0.5, %v2276_v0 }
 0x210   : > { %1471 = vadd.xlane.f32.xlu2 %v1470_v9 }
 0x212   : > { %v1009_v10 = vpop.f32.mrf.mxu2 }
 0x213   : > { %v1010_v11 = vadd.f32 %v2126_v45, %v1009_v10  ;;  %v1467_v10 = vsel %vm1325_vm1, %v1429_v4, 0.0 }
 0x214   : > { %1468 = vadd.xlane.f32.xlu1 %v1467_v10 }
 0x215   : > { %v1075_v12 = vmax.f32 %v1010_v11, 0.0  ;;  %v1461_v11 = vsel %vm1325_vm1, %v1427_v5, 0.0 }
 0x216   : > { %1462 = vadd.xlane.f32.xlu0 %v1461_v11 }
 0x217   : > { %1173 = vmatmul.f32.gmra.mxu3 %v1075_v12 }
 0x21a   : > { %v1012_v13 = vpop.f32.mrf.mxu2 }
 0x21b   : > { %v1013_v14 = vadd.f32 %v2126_v45, %v1012_v13 }
 0x21d   : > { %v1076_v54 = vmax.f32 %v1013_v14, 0.0  ;;  %v1230_v14 = vld [vmem:[%s2164_s27 + $0x28] sm:$0xff] }
 0x21f   : > { %1176 = vmatmul.f32.gmra.mxu3 %v1076_v54  ;;  %v1231_v54 = vld [vmem:[%s2164_s27 + $0x30] sm:$0xff] }
 0x220   : > { %v1267_v53 = vmul.f32 %v2169_v15, %v1231_v54 }
 0x222   : > { %v1015_v19 = vpop.f32.mrf.mxu2  ;;  %v1129_v20 = vpop.f32.mrf.mxu3 }
 0x223   : > { %v1016_v21 = vadd.f32 %v2126_v45, %v1015_v19  ;;  %v1130_v22 = vadd.f32 %v2175_v17, %v1129_v20  ;;  %v1365_v19 = vmul.f32 -0.5, %v2228_v16  ;;  %v1364_v20 = vmul.f32 -0.5, %v1231_v54 }
 0x225   : > { %v1077_v23 = vmax.f32 %v1016_v21, 0.0  ;;  %v1293_v24 = vadd.f32 %v1261_v18, %v1130_v22  ;;  %v1363_v18 = vmul.f32 -0.5, %v1230_v14  ;;  %v1396_v25 = vmul.f32 %v1364_v20, %v1231_v54 }
 0x227   : > { %1326 = vst.msk [vmem:[%s2184_s17] sm:$0xff] %vm1325_vm1, %v1293_v24  ;;  %1179 = vmatmul.f32.gmra.mxu3 %v1077_v23  ;;  %v1395_v23 = vmul.f32 %v1363_v18, %v1230_v14  ;;  %v1397_v24 = vmul.f32 %v1365_v19, %v2228_v16 }
 0x22a   : > { %v1018_v27 = vpop.f32.mrf.mxu2  ;;  %v1132_v28 = vpop.f32.mrf.mxu3 }
 0x22b   : > { %v1019_v29 = vadd.f32 %v2126_v45, %v1018_v27  ;;  %v1133_v30 = vadd.f32 %v2175_v17, %v1132_v28  ;;  %v1433_v27 = vadd.f32 %v2202_v47, %v1397_v24  ;;  %v1432_v28 = vadd.f32 %v2202_v47, %v1396_v25 }
 0x22d   : > { %v1078_v31 = vmax.f32 %v1019_v29, 0.0  ;;  %v1294_v32 = vadd.f32 %v1262_v26, %v1133_v30  ;;  %v1431_v26 = vadd.f32 %v2202_v47, %v1395_v23  ;;  %v1266_v29 = vmul.f32 %v2169_v15, %v1230_v14  ;;  %v2300_v23 = vld [vmem:[%s2164_s27 + $0x80] sm:$0xff] }
 0x22e   : > { %v1374_v25 = vmul.f32 -0.5, %v2300_v23 }
 0x22f   : > { %1327 = vst.msk [vmem:[%s2184_s17 + $0x8] sm:$0xff] %vm1325_vm1, %v1294_v32  ;;  %1182 = vmatmul.f32.gmra.mxu3 %v1078_v31  ;;  %v2239_v32 = vld [vmem:[%s2164_s27 + $0x48] sm:$0xff]  ;;  %v1473_v33 = vsel %vm1325_vm1, %v1431_v26, 0.0 }
 0x230   : > { %1474 = vadd.xlane.f32.xlu2 %v1473_v33 }
 0x232   : > { %v1021_v35 = vpop.f32.mrf.mxu2  ;;  %v1135_v37 = vpop.f32.mrf.mxu3 }
 0x233   : > { %v1022_v38 = vadd.f32 %v2126_v45, %v1021_v35  ;;  %v1136_v39 = vadd.f32 %v2175_v17, %v1135_v37  ;;  %v1476_v35 = vsel %vm1325_vm1, %v1432_v28, 0.0 }
 0x234   : > { %1477 = vadd.xlane.f32.xlu0 %v1476_v35 }
 0x235   : > { %v1079_v42 = vmax.f32 %v1022_v38, 0.0  ;;  %v1295_v43 = vadd.f32 %v1263_v34, %v1136_v39  ;;  %v1479_v34 = vsel %vm1325_vm1, %v1433_v27, 0.0  ;;  %v2247_v39 = vld [vmem:[%s2164_s27 + $0x40] sm:$0xff] }
 0x236   : > { %1480 = vadd.xlane.f32.xlu1 %v1479_v34  ;;  %v1366_v41 = vmul.f32 -0.5, %v2247_v39 }
 0x237   : > { %1328 = vst.msk [vmem:[%s2184_s17 + $0x10] sm:$0xff] %vm1325_vm1, %v1295_v43  ;;  %1185 = vmatmul.f32.gmra.mxu3 %v1079_v42  ;;  %v1368_v42 = vmul.f32 -0.5, %v2250_v40  ;;  %v1367_v43 = vmul.f32 -0.5, %v2239_v32 }
 0x238   : > { %v1398_v36 = vmul.f32 %v1366_v41, %v2247_v39 }
 0x239   : > { %v1400_v48 = vmul.f32 %v1368_v42, %v2250_v40  ;;  %v1399_v49 = vmul.f32 %v1367_v43, %v2239_v32 }
 0x23a   : > { %v1024_v51 = vpop.f32.mrf.mxu2  ;;  %v1138_v52 = vpop.f32.mrf.mxu3 }
 0x23b   : > { %v1025_v56 = vadd.f32 %v2126_v45, %v1024_v51  ;;  %v1139_v57 = vadd.f32 %v2175_v17, %v1138_v52  ;;  %v1436_v51 = vadd.f32 %v2202_v47, %v1400_v48  ;;  %v1435_v52 = vadd.f32 %v2202_v47, %v1399_v49  ;;  %v2324_v48 = vld [vmem:[%s2164_s27 + $0x88] sm:$0xff]  ;;  %v2327_v49 = vld [vmem:[%s2164_s27 + $0x98] sm:$0xff] }
 0x23d   : > { %v1080_v62 = vmax.f32 %v1025_v56, 0.0  ;;  %v1296_v63 = vadd.f32 %v1264_v50, %v1139_v57  ;;  %v1434_v50 = vadd.f32 %v2202_v47, %v1398_v36  ;;  %v1488_v58 = vsel %vm1325_vm1, %v1436_v51, 0.0 }
 0x23e   : > { %v1485_v59 = vsel %vm1325_vm1, %v1435_v52, 0.0  ;;  %1489 = vadd.xlane.f32.xlu1 %v1488_v58  ;;  %v1377_v51 = vmul.f32 -0.5, %v2327_v49 }
 0x23f   : > { %1329 = vst.msk [vmem:[%s2184_s17 + $0x18] sm:$0xff] %vm1325_vm1, %v1296_v63  ;;  %1188 = vmatmul.f32.gmra.mxu3 %v1080_v62  ;;  %v1482_v57 = vsel %vm1325_vm1, %v1434_v50, 0.0  ;;  %v2270_v62 = vld [vmem:[%s2164_s27 + $0x58] sm:$0xff]  ;;  %v2273_v63 = vld [vmem:[%s2164_s27 + $0x68] sm:$0xff]  ;;  %1486 = vadd.xlane.f32.xlu0 %v1485_v59  ;;  %v1375_v50 = vmul.f32 -0.5, %v2324_v48 }
 0x240   : > { %1483 = vadd.xlane.f32.xlu2 %v1482_v57  ;;  %v1369_v1 = vmul.f32 -0.5, %v2270_v62  ;;  %v1371_v2 = vmul.f32 -0.5, %v2273_v63  ;;  %v1409_v57 = vmul.f32 %v1377_v51, %v2327_v49 }
 0x242   : > { %v1027_v7 = vpop.f32.mrf.mxu2  ;;  %v1141_v8 = vpop.f32.mrf.mxu3 }
 0x243   : > { %v1028_v12 = vadd.f32 %v2126_v45, %v1027_v7  ;;  %v1142_v13 = vadd.f32 %v2175_v17, %v1141_v8  ;;  %v1403_v7 = vmul.f32 %v1371_v2, %v2273_v63  ;;  %v1402_v8 = vmul.f32 %v1370_v3, %v2276_v0 }
 0x245   : > { %v1081_v21 = vmax.f32 %v1028_v12, 0.0  ;;  %v1297_v22 = vadd.f32 %v1265_v6, %v1142_v13  ;;  %v1401_v6 = vmul.f32 %v1369_v1, %v2270_v62  ;;  %v1439_v10 = vadd.f32 %v2202_v47, %v1403_v7 }
 0x246   : > { %v1438_v11 = vadd.f32 %v2202_v47, %v1402_v8  ;;  %v1268_v12 = vmul.f32 %v2169_v15, %v2228_v16  ;;  %v2303_v16 = vld [vmem:[%s2164_s27 + $0x78] sm:$0xff]  ;;  %v1270_v1 = vmul.f32 %v2169_v15, %v2239_v32  ;;  %v2357_v32 = vld [vmem:[%s2164_s27 + $0xa8] sm:$0xff] }
 0x247   : > { %1330 = vst.msk [vmem:[%s2184_s17 + $0x20] sm:$0xff] %vm1325_vm1, %v1297_v22  ;;  %1191 = vmatmul.f32.gmra.mxu3 %v1081_v21  ;;  %v1437_v9 = vadd.f32 %v2202_v47, %v1401_v6  ;;  %v1497_v18 = vsel %vm1325_vm1, %v1439_v10, 0.0  ;;  %v2297_v22 = vld [vmem:[%s2164_s27 + $0x70] sm:$0xff]  ;;  %v1373_v26 = vmul.f32 -0.5, %v2303_v16 }
 0x248   : > { %v1494_v19 = vsel %vm1325_vm1, %v1438_v11, 0.0  ;;  %1498 = vadd.xlane.f32.xlu1 %v1497_v18  ;;  %v1372_v24 = vmul.f32 -0.5, %v2297_v22  ;;  %v2354_v10 = vld [vmem:[%s2164_s27 + $0xb0] sm:$0xff] }
 0x249   : > { %v1491_v54 = vsel %vm1325_vm1, %v1437_v9, 0.0  ;;  %1495 = vadd.xlane.f32.xlu0 %v1494_v19  ;;  %v2351_v9 = vld [vmem:[%s2164_s27 + $0xa0] sm:$0xff] }
 0x24a   : > { %v1030_v30 = vpop.f32.mrf.mxu2  ;;  %v1144_v31 = vpop.f32.mrf.mxu3  ;;  %1492 = vadd.xlane.f32.xlu2 %v1491_v54  ;;  %v1378_v11 = vmul.f32 -0.5, %v2351_v9 }
 0x24b   : > { %v1031_v37 = vadd.f32 %v2126_v45, %v1030_v30  ;;  %v1145_v38 = vadd.f32 %v2175_v17, %v1144_v31  ;;  %v1406_v30 = vmul.f32 %v1374_v25, %v2300_v23  ;;  %v1405_v31 = vmul.f32 %v1373_v26, %v2303_v16 }
 0x24c   : > { %v1410_v18 = vmul.f32 %v1378_v11, %v2351_v9  ;;  %v1271_v26 = vmul.f32 %v2169_v15, %v2250_v40  ;;  %v2384_v40 = vld [vmem:[%s2164_s27 + $0xc0] sm:$0xff] }
 0x24d   : > { %v1082_v44 = vmax.f32 %v1031_v37, 0.0  ;;  %v1298_v46 = vadd.f32 %v1266_v29, %v1145_v38  ;;  %v1404_v29 = vmul.f32 %v1372_v24, %v2297_v22  ;;  %v1442_v34 = vadd.f32 %v2202_v47, %v1406_v30 }
 0x24e   : > { %v1441_v35 = vadd.f32 %v2202_v47, %v1405_v31  ;;  %v1269_v37 = vmul.f32 %v2169_v15, %v2247_v39  ;;  %v2330_v39 = vld [vmem:[%s2164_s27 + $0x90] sm:$0xff] }
 0x24f   : > { %1331 = vst.msk [vmem:[%s2184_s17 + $0x28] sm:$0xff] %vm1325_vm1, %v1298_v46  ;;  %1194 = vmatmul.f32.gmra.mxu3 %v1082_v44  ;;  %v1440_v33 = vadd.f32 %v2202_v47, %v1404_v29  ;;  %v1506_v43 = vsel %vm1325_vm1, %v1442_v34, 0.0  ;;  %v1376_v52 = vmul.f32 -0.5, %v2330_v39 }
 0x250   : > { %v1503_v44 = vsel %vm1325_vm1, %v1441_v35, 0.0  ;;  %1507 = vadd.xlane.f32.xlu1 %v1506_v43  ;;  %v2378_v35 = vld [vmem:[%s2164_s27 + $0xb8] sm:$0xff] }
 0x251   : > { %v1500_v42 = vsel %vm1325_vm1, %v1440_v33, 0.0  ;;  %1504 = vadd.xlane.f32.xlu0 %v1503_v44  ;;  %v1408_v58 = vmul.f32 %v1376_v52, %v2330_v39 }
 0x252   : > { %v1033_v55 = vpop.f32.mrf.mxu2  ;;  %v1147_v56 = vpop.f32.mrf.mxu3  ;;  %1501 = vadd.xlane.f32.xlu2 %v1500_v42  ;;  %v1382_v42 = vmul.f32 -0.5, %v2384_v40 }
 0x253   : > { %v1034_v60 = vadd.f32 %v2126_v45, %v1033_v55  ;;  %v1148_v61 = vadd.f32 %v2175_v17, %v1147_v56  ;;  %v1407_v56 = vmul.f32 %v1375_v50, %v2324_v48 }
 0x254   : > { %v1414_v50 = vmul.f32 %v1382_v42, %v2384_v40 }
 0x255   : > { %v1083_v4 = vmax.f32 %v1034_v60, 0.0  ;;  %v1299_v5 = vadd.f32 %v1267_v53, %v1148_v61  ;;  %v1443_v59 = vadd.f32 %v2202_v47, %v1407_v56  ;;  %v1445_v60 = vadd.f32 %v2202_v47, %v1409_v57 }
 0x256   : > { %v1444_v61 = vadd.f32 %v2202_v47, %v1408_v58 }
 0x257   : > { %1332 = vst.msk [vmem:[%s2184_s17 + $0x30] sm:$0xff] %vm1325_vm1, %v1299_v5  ;;  %1197 = vmatmul.f32.gmra.mxu3 %v1083_v4  ;;  %v1509_v4 = vsel %vm1325_vm1, %v1443_v59, 0.0  ;;  %v1515_v5 = vsel %vm1325_vm1, %v1445_v60, 0.0 }
 0x258   : > { %v1512_v6 = vsel %vm1325_vm1, %v1444_v61, 0.0  ;;  %1516 = vadd.xlane.f32.xlu1 %v1515_v5 }
 0x259   : > { %1513 = vadd.xlane.f32.xlu0 %v1512_v6 }
 0x25a   : > { %v1036_v13 = vpop.f32.mrf.mxu2  ;;  %v1150_v14 = vpop.f32.mrf.mxu3  ;;  %1510 = vadd.xlane.f32.xlu2 %v1509_v4 }
 0x25b   : > { %v1037_v20 = vadd.f32 %v2126_v45, %v1036_v13  ;;  %v1151_v21 = vadd.f32 %v2175_v17, %v1150_v14  ;;  %v1379_v13 = vmul.f32 -0.5, %v2357_v32 }
 0x25d   : > { %v1084_v27 = vmax.f32 %v1037_v20, 0.0  ;;  %v1300_v28 = vadd.f32 %v1268_v12, %v1151_v21  ;;  %v1380_v12 = vmul.f32 -0.5, %v2354_v10  ;;  %v1411_v20 = vmul.f32 %v1379_v13, %v2357_v32 }
 0x25e   : > { %v1446_v21 = vadd.f32 %v2202_v47, %v1410_v18 }
 0x25f   : > { %1333 = vst.msk [vmem:[%s2184_s17 + $0x38] sm:$0xff] %vm1325_vm1, %v1300_v28  ;;  %1200 = vmatmul.f32.gmra.mxu3 %v1084_v27  ;;  %v1412_v19 = vmul.f32 %v1380_v12, %v2354_v10  ;;  %v1447_v25 = vadd.f32 %v2202_v47, %v1411_v20 }
 0x260   : > { %v1518_v29 = vsel %vm1325_vm1, %v1446_v21, 0.0 }
 0x261   : > { %v1448_v24 = vadd.f32 %v2202_v47, %v1412_v19  ;;  %v1521_v31 = vsel %vm1325_vm1, %v1447_v25, 0.0  ;;  %v1273_v19 = vmul.f32 %v2169_v15, %v2276_v0  ;;  %v2438_v0 = vld [vmem:[%s2164_s27 + $0xf0] sm:$0xff] }
 0x262   : > { %v1039_v38 = vpop.f32.mrf.mxu2  ;;  %v1153_v41 = vpop.f32.mrf.mxu3  ;;  %1519 = vadd.xlane.f32.xlu2 %v1518_v29  ;;  %1522 = vadd.xlane.f32.xlu0 %v1521_v31  ;;  %v2432_v29 = vld [vmem:[%s2164_s27 + $0xe8] sm:$0xff] }
 0x263   : > { %v1040_v46 = vadd.f32 %v2126_v45, %v1039_v38  ;;  %v1154_v36 = vadd.f32 %v2175_v17, %v1153_v41  ;;  %v1524_v30 = vsel %vm1325_vm1, %v1448_v24, 0.0  ;;  %v1381_v38 = vmul.f32 -0.5, %v2378_v35 }
 0x264   : > { %1525 = vadd.xlane.f32.xlu1 %v1524_v30  ;;  %v2435_v30 = vld [vmem:[%s2164_s27 + $0xf8] sm:$0xff]  ;;  %v1387_v31 = vmul.f32 -0.5, %v2432_v29 }
 0x265   : > { %v1085_v53 = vmax.f32 %v1040_v46, 0.0  ;;  %v1301_v55 = vadd.f32 %v1269_v37, %v1154_v36  ;;  %v2381_v37 = vld [vmem:[%s2164_s27 + $0xc8] sm:$0xff]  ;;  %v1413_v46 = vmul.f32 %v1381_v38, %v2378_v35 }
 0x266   : > { %v1383_v41 = vmul.f32 -0.5, %v2381_v37  ;;  %v1419_v42 = vmul.f32 %v1387_v31, %v2432_v29 }
 0x267   : > { %1334 = vst.msk [vmem:[%s2184_s17 + $0x40] sm:$0xff] %vm1325_vm1, %v1301_v55  ;;  %1203 = vmatmul.f32.gmra.mxu3 %v1085_v53  ;;  %v1449_v51 = vadd.f32 %v2202_v47, %v1413_v46  ;;  %v1450_v53 = vadd.f32 %v2202_v47, %v1414_v50  ;;  %v1272_v55 = vmul.f32 %v2169_v15, %v2270_v62  ;;  %v2411_v62 = vld [vmem:[%s2164_s27 + $0xd8] sm:$0xff] }
 0x268   : > { %v1415_v36 = vmul.f32 %v1383_v41, %v2381_v37  ;;  %v1385_v6 = vmul.f32 -0.5, %v2411_v62  ;;  %v1455_v46 = vadd.f32 %v2202_v47, %v1419_v42 }
 0x269   : > { %v1527_v58 = vsel %vm1325_vm1, %v1449_v51, 0.0  ;;  %v1530_v60 = vsel %vm1325_vm1, %v1450_v53, 0.0  ;;  %v1274_v51 = vmul.f32 %v2169_v15, %v2273_v63  ;;  %v1275_v63 = vmul.f32 %v2169_v15, %v2297_v22 }
 0x26a   : > { %v1042_v2 = vpop.f32.mrf.mxu2  ;;  %v1156_v3 = vpop.f32.mrf.mxu3  ;;  %v1451_v52 = vadd.f32 %v2202_v47, %v1415_v36  ;;  %1528 = vadd.xlane.f32.xlu2 %v1527_v58  ;;  %1531 = vadd.xlane.f32.xlu0 %v1530_v60  ;;  %v1417_v13 = vmul.f32 %v1385_v6, %v2411_v62 }
 0x26b   : > { %v1043_v7 = vadd.f32 %v2126_v45, %v1042_v2  ;;  %v1157_v8 = vadd.f32 %v2175_v17, %v1156_v3  ;;  %v2405_v2 = vld [vmem:[%s2164_s27 + $0xd0] sm:$0xff]  ;;  %v2408_v3 = vld [vmem:[%s2164_s27 + $0xe0] sm:$0xff] }
 0x26c   : > { %v1533_v59 = vsel %vm1325_vm1, %v1451_v52, 0.0  ;;  %v1384_v4 = vmul.f32 -0.5, %v2405_v2  ;;  %v1386_v5 = vmul.f32 -0.5, %v2408_v3  ;;  %v1453_v18 = vadd.f32 %v2202_v47, %v1417_v13 }
 0x26d   : > { %v1086_v14 = vmax.f32 %v1043_v7, 0.0  ;;  %v1302_v54 = vadd.f32 %v1270_v1, %v1157_v8  ;;  %1534 = vadd.xlane.f32.xlu1 %v1533_v59 }
 0x26e   : > { %v1416_v11 = vmul.f32 %v1384_v4, %v2405_v2  ;;  %v1418_v12 = vmul.f32 %v1386_v5, %v2408_v3 }
 0x26f   : > { %1335 = vst.msk [vmem:[%s2184_s17 + $0x48] sm:$0xff] %vm1325_vm1, %v1302_v54  ;;  %1206 = vmatmul.f32.gmra.mxu3 %v1086_v14 }
 0x270   : > { %v1452_v14 = vadd.f32 %v2202_v47, %v1416_v11  ;;  %v1454_v54 = vadd.f32 %v2202_v47, %v1418_v12 }
 0x272   : > { %v1045_v27 = vpop.f32.mrf.mxu2  ;;  %v1159_v28 = vpop.f32.mrf.mxu3  ;;  %v1536_v24 = vsel %vm1325_vm1, %v1452_v14, 0.0  ;;  %v1542_v25 = vsel %vm1325_vm1, %v1454_v54, 0.0 }
 0x273   : > { %v1046_v33 = vadd.f32 %v2126_v45, %v1045_v27  ;;  %v1160_v34 = vadd.f32 %v2175_v17, %v1159_v28  ;;  %1537 = vadd.xlane.f32.xlu2 %v1536_v24 }
 0x275   : > { %v1087_v43 = vmax.f32 %v1046_v33, 0.0  ;;  %v1303_v44 = vadd.f32 %v1271_v26, %v1160_v34  ;;  %v1539_v26 = vsel %vm1325_vm1, %v1453_v18, 0.0  ;;  %1543 = vadd.xlane.f32.xlu1 %v1542_v25  ;;  %v1389_v33 = vmul.f32 -0.5, %v2435_v30 }
 0x276   : > { %1540 = vadd.xlane.f32.xlu0 %v1539_v26  ;;  %v1388_v34 = vmul.f32 -0.5, %v2438_v0  ;;  %v1278_v18 = vmul.f32 %v2169_v15, %v2324_v48  ;;  %v1279_v48 = vmul.f32 %v2169_v15, %v2330_v39  ;;  %v1280_v39 = vmul.f32 %v2169_v15, %v2327_v49 }
 0x277   : > { %1336 = vst.msk [vmem:[%s2184_s17 + $0x50] sm:$0xff] %vm1325_vm1, %v1303_v44  ;;  %1209 = vmatmul.f32.gmra.mxu3 %v1087_v43  ;;  %v1421_v43 = vmul.f32 %v1389_v33, %v2435_v30  ;;  %v1281_v49 = vmul.f32 %v2169_v15, %v2351_v9  ;;  %v1282_v9 = vmul.f32 %v2169_v15, %v2357_v32 }
 0x278   : > { %v1420_v44 = vmul.f32 %v1388_v34, %v2438_v0  ;;  %v1283_v32 = vmul.f32 %v2169_v15, %v2354_v10  ;;  %v1284_v10 = vmul.f32 %v2169_v15, %v2378_v35  ;;  %v1285_v35 = vmul.f32 %v2169_v15, %v2384_v40 }
 0x279   : > { %v1457_v36 = vadd.f32 %v2202_v47, %v1421_v43  ;;  %v1286_v40 = vmul.f32 %v2169_v15, %v2381_v37  ;;  %v1287_v37 = vmul.f32 %v2169_v15, %v2405_v2  ;;  %v1288_v2 = vmul.f32 %v2169_v15, %v2411_v62 }
 0x27a   : > { %v1048_v56 = vpop.f32.mrf.mxu2  ;;  %v1162_v57 = vpop.f32.mrf.mxu3  ;;  %v1456_v50 = vadd.f32 %v2202_v47, %v1420_v44  ;;  %v1289_v62 = vmul.f32 %v2169_v15, %v2408_v3  ;;  %v1291_v3 = vmul.f32 %v2169_v15, %v2438_v0 }
 0x27b   : > { %v1049_v61 = vadd.f32 %v2126_v45, %v1048_v56  ;;  %v1163_v1 = vadd.f32 %v2175_v17, %v1162_v57  ;;  %v1551_v56 = vsel %vm1325_vm1, %v1457_v36, 0.0 }
 0x27c   : > { %v1548_v57 = vsel %vm1325_vm1, %v1456_v50, 0.0 }
 0x27d   : > { %v1088_v7 = vmax.f32 %v1049_v61, 0.0  ;;  %v1304_v8 = vadd.f32 %v1272_v55, %v1163_v1  ;;  %v1545_v55 = vsel %vm1325_vm1, %v1455_v46, 0.0  ;;  %1552 = vadd.xlane.f32.xlu1 %v1551_v56 }
 0x27e   : > { %1546 = vadd.xlane.f32.xlu2 %v1545_v55  ;;  %1549 = vadd.xlane.f32.xlu0 %v1548_v57 }
 0x27f   : > { %1337 = vst.msk [vmem:[%s2184_s17 + $0x58] sm:$0xff] %vm1325_vm1, %v1304_v8  ;;  %1212 = vmatmul.f32.gmra.mxu3 %v1088_v7  ;;  %v1276_v8 = vmul.f32 %v2169_v15, %v2303_v16 }
 0x282   : > { %v1051_v20 = vpop.f32.mrf.mxu2  ;;  %v1165_v21 = vpop.f32.mrf.mxu3 }
 0x283   : > { %v1052_v27 = vadd.f32 %v2126_v45, %v1051_v20  ;;  %v1166_v28 = vadd.f32 %v2175_v17, %v1165_v21  ;;  %v1460_v21 = vpop.xlane.xlu0 %1459 }
 0x284   : > { %1555 = vst.msk [vmem:[%s2483_s23] sm:$0xff] %vm1554_vm2, %v1460_v21 }
 0x285   : > { %v1089_v38 = vmax.f32 %v1052_v27, 0.0  ;;  %v1305_v41 = vadd.f32 %v1273_v19, %v1166_v28  ;;  %v1472_v27 = vpop.xlane.xlu2 %1471 }
 0x286   : > { %1559 = vst.msk [vmem:[%s2483_s23 + $0x20] sm:$0xff] %vm1554_vm2, %v1472_v27 }
 0x287   : > { %1338 = vst.msk [vmem:[%s2184_s17 + $0x60] sm:$0xff] %vm1325_vm1, %v1305_v41  ;;  %1215 = vmatmul.f32.gmra.mxu3 %v1089_v38 }
 0x28a   : > { %v1054_v52 = vpop.f32.mrf.mxu2  ;;  %v1168_v53 = vpop.f32.mrf.mxu3 }
 0x28b   : > { %v1055_v58 = vadd.f32 %v2126_v45, %v1054_v52  ;;  %v1169_v59 = vadd.f32 %v2175_v17, %v1168_v53  ;;  %v1463_v31 = vpop.xlane.xlu0 %1462 }
 0x28c   : > { %1556 = vst.msk [vmem:[%s2483_s23 + $0x8] sm:$0xff] %vm1554_vm2, %v1463_v31 }
 0x28d   : > { %v1090_v47 = vmax.f32 %v1055_v58, 0.0  ;;  %v1306_v60 = vadd.f32 %v1274_v51, %v1169_v59 }
 0x28f   : > { %1339 = vst.msk [vmem:[%s2184_s17 + $0x68] sm:$0xff] %vm1325_vm1, %v1306_v60  ;;  %1218 = vmatmul.f32.gmra.mxu3 %v1090_v47 }
 0x292   : > { %v1057_v61 = vpop.f32.mrf.mxu2  ;;  %v1171_v1 = vpop.f32.mrf.mxu3 }
 0x293   : > { %v1058_v4 = vadd.f32 %v2126_v45, %v1057_v61  ;;  %v1172_v5 = vadd.f32 %v2175_v17, %v1171_v1  ;;  %v1277_v45 = vmul.f32 %v2169_v15, %v2300_v23  ;;  %v1466_v23 = vpop.xlane.xlu1 %1465 }
 0x294   : > { %1557 = vst.msk [vmem:[%s2483_s23 + $0x10] sm:$0xff] %vm1554_vm2, %v1466_v23 }
 0x295   : > { %v1091_v6 = vmax.f32 %v1058_v4, 0.0  ;;  %v1307_v7 = vadd.f32 %v1275_v63, %v1172_v5 }
 0x297   : > { %1340 = vst.msk [vmem:[%s2184_s17 + $0x70] sm:$0xff] %vm1325_vm1, %v1307_v7  ;;  %1221 = vmatmul.f32.gmra.mxu3 %v1091_v6 }
 0x29a   : > { %v1174_v11 = vpop.f32.mrf.mxu3 }
 0x29b   : > { %v1175_v12 = vadd.f32 %v2175_v17, %v1174_v11  ;;  %v1469_v28 = vpop.xlane.xlu1 %1468 }
 0x29c   : > { %1558 = vst.msk [vmem:[%s2483_s23 + $0x18] sm:$0xff] %vm1554_vm2, %v1469_v28 }
 0x29d   : > { %v1308_v22 = vadd.f32 %v1276_v8, %v1175_v12 }
 0x29f   : > { %1341 = vst.msk [vmem:[%s2184_s17 + $0x78] sm:$0xff] %vm1325_vm1, %v1308_v22 }
 0x2a2   : > { %v1177_v13 = vpop.f32.mrf.mxu3 }
 0x2a3   : > { %v1178_v14 = vadd.f32 %v2175_v17, %v1177_v13  ;;  %v1475_v41 = vpop.xlane.xlu2 %1474 }
 0x2a4   : > { %1560 = vst.msk [vmem:[%s2483_s23 + $0x28] sm:$0xff] %vm1554_vm2, %v1475_v41 }
 0x2a5   : > { %v1309_v54 = vadd.f32 %v1277_v45, %v1178_v14 }
 0x2a7   : > { %1342 = vst.msk [vmem:[%s2184_s17 + $0x80] sm:$0xff] %vm1325_vm1, %v1309_v54  ;;  %v1478_v43 = vpop.xlane.xlu0 %1477 }
 0x2a8   : > { %1561 = vst.msk [vmem:[%s2483_s23 + $0x30] sm:$0xff] %vm1554_vm2, %v1478_v43 }
 0x2a9   : > { %v1481_v42 = vpop.xlane.xlu1 %1480 }
 0x2aa   : > { %v1180_v16 = vpop.f32.mrf.mxu3  ;;  %1562 = vst.msk [vmem:[%s2483_s23 + $0x38] sm:$0xff] %vm1554_vm2, %v1481_v42 }
 0x2ab   : > { %v1181_v19 = vadd.f32 %v2175_v17, %v1180_v16 }
 0x2ad   : > { %v1310_v20 = vadd.f32 %v1278_v18, %v1181_v19 }
 0x2af   : > { %1343 = vst.msk [vmem:[%s2184_s17 + $0x88] sm:$0xff] %vm1325_vm1, %v1310_v20 }
 0x2b1   : > { %v1490_v51 = vpop.xlane.xlu1 %1489 }
 0x2b2   : > { %v1183_v24 = vpop.f32.mrf.mxu3  ;;  %v1487_v52 = vpop.xlane.xlu0 %1486  ;;  %1565 = vst.msk [vmem:[%s2483_s23 + $0x50] sm:$0xff] %vm1554_vm2, %v1490_v51 }
 0x2b3   : > { %v1184_v25 = vadd.f32 %v2175_v17, %v1183_v24  ;;  %v1484_v50 = vpop.xlane.xlu2 %1483  ;;  %1564 = vst.msk [vmem:[%s2483_s23 + $0x48] sm:$0xff] %vm1554_vm2, %v1487_v52 }
 0x2b4   : > { %1563 = vst.msk [vmem:[%s2483_s23 + $0x40] sm:$0xff] %vm1554_vm2, %v1484_v50 }
 0x2b5   : > { %v1311_v26 = vadd.f32 %v1279_v48, %v1184_v25 }
 0x2b7   : > { %1344 = vst.msk [vmem:[%s2184_s17 + $0x90] sm:$0xff] %vm1325_vm1, %v1311_v26 }
 0x2ba   : > { %v1186_v33 = vpop.f32.mrf.mxu3 }
 0x2bb   : > { %v1187_v34 = vadd.f32 %v2175_v17, %v1186_v33  ;;  %v1499_v58 = vpop.xlane.xlu1 %1498 }
 0x2bc   : > { %v1496_v59 = vpop.xlane.xlu0 %1495  ;;  %1568 = vst.msk [vmem:[%s2483_s23 + $0x68] sm:$0xff] %vm1554_vm2, %v1499_v58 }
 0x2bd   : > { %v1312_v38 = vadd.f32 %v1280_v39, %v1187_v34  ;;  %v1493_v57 = vpop.xlane.xlu2 %1492  ;;  %1567 = vst.msk [vmem:[%s2483_s23 + $0x60] sm:$0xff] %vm1554_vm2, %v1496_v59 }
 0x2be   : > { %1566 = vst.msk [vmem:[%s2483_s23 + $0x58] sm:$0xff] %vm1554_vm2, %v1493_v57 }
 0x2bf   : > { %1345 = vst.msk [vmem:[%s2184_s17 + $0x98] sm:$0xff] %vm1325_vm1, %v1312_v38 }
 0x2c2   : > { %v1189_v44 = vpop.f32.mrf.mxu3 }
 0x2c3   : > { %v1190_v46 = vadd.f32 %v2175_v17, %v1189_v44  ;;  %v1508_v1 = vpop.xlane.xlu1 %1507 }
 0x2c4   : > { %v1505_v4 = vpop.xlane.xlu0 %1504  ;;  %1571 = vst.msk [vmem:[%s2483_s23 + $0x80] sm:$0xff] %vm1554_vm2, %v1508_v1 }
 0x2c5   : > { %v1313_v36 = vadd.f32 %v1281_v49, %v1190_v46  ;;  %v1502_v61 = vpop.xlane.xlu2 %1501  ;;  %1570 = vst.msk [vmem:[%s2483_s23 + $0x78] sm:$0xff] %vm1554_vm2, %v1505_v4  ;;  %v1290_v46 = vmul.f32 %v2169_v15, %v2432_v29 }
 0x2c6   : > { %1569 = vst.msk [vmem:[%s2483_s23 + $0x70] sm:$0xff] %vm1554_vm2, %v1502_v61 }
 0x2c7   : > { %1346 = vst.msk [vmem:[%s2184_s17 + $0xa0] sm:$0xff] %vm1325_vm1, %v1313_v36 }
 0x2ca   : > { %v1192_v53 = vpop.f32.mrf.mxu3 }
 0x2cb   : > { %v1193_v55 = vadd.f32 %v2175_v17, %v1192_v53  ;;  %v1517_v11 = vpop.xlane.xlu1 %1516 }
 0x2cc   : > { %v1514_v12 = vpop.xlane.xlu0 %1513  ;;  %1574 = vst.msk [vmem:[%s2483_s23 + $0x98] sm:$0xff] %vm1554_vm2, %v1517_v11 }
 0x2cd   : > { %v1314_v56 = vadd.f32 %v1282_v9, %v1193_v55  ;;  %v1511_v8 = vpop.xlane.xlu2 %1510  ;;  %1573 = vst.msk [vmem:[%s2483_s23 + $0x90] sm:$0xff] %vm1554_vm2, %v1514_v12  ;;  %v1292_v55 = vmul.f32 %v2169_v15, %v2435_v30 }
 0x2ce   : > { %1572 = vst.msk [vmem:[%s2483_s23 + $0x88] sm:$0xff] %vm1554_vm2, %v1511_v8 }
 0x2cf   : > { %1347 = vst.msk [vmem:[%s2184_s17 + $0xa8] sm:$0xff] %vm1325_vm1, %v1314_v56 }
 0x2d2   : > { %v1195_v47 = vpop.f32.mrf.mxu3 }
 0x2d3   : > { %v1196_v60 = vadd.f32 %v2175_v17, %v1195_v47 }
 0x2d5   : > { %v1315_v63 = vadd.f32 %v1283_v32, %v1196_v60  ;;  %v1520_v14 = vpop.xlane.xlu2 %1519  ;;  %v1523_v18 = vpop.xlane.xlu0 %1522 }
 0x2d6   : > { %1575 = vst.msk [vmem:[%s2483_s23 + $0xa0] sm:$0xff] %vm1554_vm2, %v1520_v14 }
 0x2d7   : > { %1348 = vst.msk [vmem:[%s2184_s17 + $0xb0] sm:$0xff] %vm1325_vm1, %v1315_v63  ;;  %v1526_v54 = vpop.xlane.xlu1 %1525 }
 0x2d8   : > { %1577 = vst.msk [vmem:[%s2483_s23 + $0xb0] sm:$0xff] %vm1554_vm2, %v1526_v54 }
 0x2d9   : > { %1576 = vst.msk [vmem:[%s2483_s23 + $0xa8] sm:$0xff] %vm1554_vm2, %v1523_v18 }
 0x2da   : > { %v1198_v5 = vpop.f32.mrf.mxu3 }
 0x2db   : > { %v1199_v6 = vadd.f32 %v2175_v17, %v1198_v5 }
 0x2dd   : > { %v1316_v7 = vadd.f32 %v1284_v10, %v1199_v6  ;;  %v1529_v23 = vpop.xlane.xlu2 %1528  ;;  %v1532_v48 = vpop.xlane.xlu0 %1531 }
 0x2de   : > { %1578 = vst.msk [vmem:[%s2483_s23 + $0xb8] sm:$0xff] %vm1554_vm2, %v1529_v23 }
 0x2df   : > { %1349 = vst.msk [vmem:[%s2184_s17 + $0xb8] sm:$0xff] %vm1325_vm1, %v1316_v7 }
 0x2e0   : > { %v1535_v21 = vpop.xlane.xlu1 %1534  ;;  %1579 = vst.msk [vmem:[%s2483_s23 + $0xc0] sm:$0xff] %vm1554_vm2, %v1532_v48 }
 0x2e1   : > { %1580 = vst.msk [vmem:[%s2483_s23 + $0xc8] sm:$0xff] %vm1554_vm2, %v1535_v21 }
 0x2e2   : > { %v1201_v22 = vpop.f32.mrf.mxu3 }
 0x2e3   : > { %v1202_v45 = vadd.f32 %v2175_v17, %v1201_v22 }
 0x2e5   : > { %v1317_v13 = vadd.f32 %v1285_v35, %v1202_v45 }
 0x2e6   : > { %v1538_v27 = vpop.xlane.xlu2 %1537 }
 0x2e7   : > { %1350 = vst.msk [vmem:[%s2184_s17 + $0xc0] sm:$0xff] %vm1325_vm1, %v1317_v13 }
 0x2e8   : > { %v1544_v28 = vpop.xlane.xlu1 %1543  ;;  %1581 = vst.msk [vmem:[%s2483_s23 + $0xd0] sm:$0xff] %vm1554_vm2, %v1538_v27 }
 0x2e9   : > { %v1541_v31 = vpop.xlane.xlu0 %1540  ;;  %1583 = vst.msk [vmem:[%s2483_s23 + $0xe0] sm:$0xff] %vm1554_vm2, %v1544_v28 }
 0x2ea   : > { %v1204_v16 = vpop.f32.mrf.mxu3  ;;  %1582 = vst.msk [vmem:[%s2483_s23 + $0xd8] sm:$0xff] %vm1554_vm2, %v1541_v31 }
 0x2eb   : > { %v1205_v19 = vadd.f32 %v2175_v17, %v1204_v16 }
 0x2ed   : > { %v1318_v20 = vadd.f32 %v1286_v40, %v1205_v19 }
 0x2ef   : > { %1351 = vst.msk [vmem:[%s2184_s17 + $0xc8] sm:$0xff] %vm1325_vm1, %v1318_v20 }
 0x2f0   : > { %v1553_v41 = vpop.xlane.xlu1 %1552 }
 0x2f1   : > { %v1547_v38 = vpop.xlane.xlu2 %1546  ;;  %v1550_v42 = vpop.xlane.xlu0 %1549  ;;  %1586 = vst.msk [vmem:[%s2483_s23 + $0xf8] sm:$0xff] %vm1554_vm2, %v1553_v41 }
 0x2f2   : > { %v1207_v24 = vpop.f32.mrf.mxu3  ;;  %1584 = vst.msk [vmem:[%s2483_s23 + $0xe8] sm:$0xff] %vm1554_vm2, %v1547_v38 }
 0x2f3   : > { %v1208_v25 = vadd.f32 %v2175_v17, %v1207_v24  ;;  %1585 = vst.msk [vmem:[%s2483_s23 + $0xf0] sm:$0xff] %vm1554_vm2, %v1550_v42 }
 0x2f5   : > { %v1319_v26 = vadd.f32 %v1287_v37, %v1208_v25 }
 0x2f7   : > { %1352 = vst.msk [vmem:[%s2184_s17 + $0xd0] sm:$0xff] %vm1325_vm1, %v1319_v26 }
 0x2fa   : > { %v1210_v39 = vpop.f32.mrf.mxu3 }
 0x2fb   : > { %v1211_v33 = vadd.f32 %v2175_v17, %v1210_v39 }
 0x2fd   : > { %v1320_v34 = vadd.f32 %v1288_v2, %v1211_v33 }
 0x2ff   : > { %1353 = vst.msk [vmem:[%s2184_s17 + $0xd8] sm:$0xff] %vm1325_vm1, %v1320_v34 }
 0x302   : > { %v1213_v43 = vpop.f32.mrf.mxu3 }
 0x303   : > { %v1214_v49 = vadd.f32 %v2175_v17, %v1213_v43 }
 0x305   : > { %v1321_v44 = vadd.f32 %v1289_v62, %v1214_v49 }
 0x307   : > { %1354 = vst.msk [vmem:[%s2184_s17 + $0xe0] sm:$0xff] %vm1325_vm1, %v1321_v44 }
 0x30a   : > { %v1216_v36 = vpop.f32.mrf.mxu3 }
 0x30b   : > { %v1217_v50 = vadd.f32 %v2175_v17, %v1216_v36 }
 0x30d   : > { %v1322_v51 = vadd.f32 %v1290_v46, %v1217_v50 }
 0x30f   : > { %1355 = vst.msk [vmem:[%s2184_s17 + $0xe8] sm:$0xff] %vm1325_vm1, %v1322_v51 }
 0x312   : > { %v1219_v52 = vpop.f32.mrf.mxu3 }
 0x313   : > { %v1220_v9 = vadd.f32 %v2175_v17, %v1219_v52 }
 0x315   : > { %v1323_v53 = vadd.f32 %v1291_v3, %v1220_v9 }
 0x317   : > { %1356 = vst.msk [vmem:[%s2184_s17 + $0xf0] sm:$0xff] %vm1325_vm1, %v1323_v53 }
 0x31a   : > { %v1222_v56 = vpop.f32.mrf.mxu3 }
 0x31b   : > { %v1223_v29 = vadd.f32 %v2175_v17, %v1222_v56 }
 0x31d   : > { %v1324_v57 = vadd.f32 %v1292_v55, %v1223_v29 }
 0x31f   : > { %1357 = vst.msk [vmem:[%s2184_s17 + $0xf8] sm:$0xff] %vm1325_vm1, %v1324_v57 }
 0x320 PF: > { %s24_s25 = sadd.s32 1, %s1756_s25  }
 0x321   : > { %p21_p4 = scmp.ge.s32.totalorder %s24_s25, 4  }
 0x323   :  { %23 = sbr.rel (!%p21_p4) target bundleno = 1 (0x1), region = 113 }

</bundles_post_ra>
